<compile_context>
chip_gen: v5e
topology: v5e:2x2
jax: 0.10.0
libtpu: 0.0.40
codegen_flags: <defaults>
</compile_context>

<pallas_src>
import functools
import math

import jax
import jax.numpy as jnp
from jax.experimental import pallas as pl
from jax.experimental.pallas import tpu as pltpu


# ----------------------------- Pallas kernel --------------------------------
def _ccb_fused_kernel(*refs, n_layers, pad, ksize, residual):
    """Fused ComplexConvBlock forward for ONE channel group (grid axis g).

    refs layout:
      refs[0]                  x_ref   : (N, Cg_in, T)   input block (this group)
      refs[1 : 1+3L]           per layer l: gamma (Cg_l,1), beta (Cg_l,1),
                               w (Oh, K*Cg_l)  im2col-reshaped combined weight
      refs[1+3L]               o_ref   : (N, Oh, T_out)
      refs[2+3L]               xpad_ref: (N, Cg_max, Tpad_max) VMEM scratch
    """
    x_ref = refs[0]
    param_refs = refs[1:1 + 3 * n_layers]
    o_ref = refs[1 + 3 * n_layers]
    xpad_ref = refs[2 + 3 * n_layers]

    eps = 1e-5
    x = x_ref[...].astype(jnp.float32)            # (N, Cg, T)
    x0 = x                                        # residual source
    N = x.shape[0]

    for l in range(n_layers):                     # static Python loop (fused layers)
        gamma = param_refs[3 * l][...].astype(jnp.float32)      # (Cg, 1)
        beta = param_refs[3 * l + 1][...].astype(jnp.float32)   # (Cg, 1)
        w = param_refs[3 * l + 2][...].astype(jnp.float32)      # (Oh, K*Cg)
        Cg, T = x.shape[1], x.shape[2]
        Oh = w.shape[0]
        Tout = T + 2 * pad - (ksize - 1)

        # --- BatchNorm1d (training mode, biased batch stats over (N, T)),
        #     affine folded into a single per-channel scale/shift -------------
        inv_nt = 1.0 / (N * T)
        mean = jnp.sum(jnp.sum(x, axis=2, keepdims=True),
                       axis=0, keepdims=True) * inv_nt          # (1, Cg, 1)
        d = x - mean
        var = jnp.sum(jnp.sum(d * d, axis=2, keepdims=True),
                      axis=0, keepdims=True) * inv_nt           # (1, Cg, 1)
        scale = gamma[None] * jax.lax.rsqrt(var + eps)          # (1, Cg, 1)
        xn = d * scale + beta[None]

        # --- LeakyReLU (default negative_slope = 0.01) -----------------------
        xn = jnp.where(xn >= 0, xn, 0.01 * xn)

        # --- reflect pad: one bulk store + 2*pad boundary columns into a
        #     VMEM scratch (no 1-wide lane concatenations) --------------------
        if pad > 0:
            xpad_ref[:, :Cg, pad:pad + T] = xn
            for p in range(pad):
                # left:  xpad[p]           = xn[pad - p]
                xpad_ref[:, :Cg, p:p + 1] = xn[:, :, pad - p:pad - p + 1]
                # right: xpad[pad + T + p] = xn[T - 2 - p]
                xpad_ref[:, :Cg, pad + T + p:pad + T + p + 1] = \
                    xn[:, :, T - 2 - p:T - 1 - p]
            taps = [xpad_ref[:, :Cg, k:k + Tout] for k in range(ksize)]
        else:
            taps = [xn[:, :, k:k + Tout] for k in range(ksize)]

        # --- grouped complex conv as ONE batched MXU matmul per layer:
        #     im2col over the K taps (sublane concat), then
        #     (Oh, K*Cg) @ (K*Cg, Tout) batched over N -------------------------
        xcol = jnp.concatenate(taps, axis=1)                    # (N, K*Cg, Tout)
        wb = jnp.broadcast_to(w[None], (N, Oh, ksize * Cg))
        x = jnp.einsum('nom,nmt->not', wb, xcol,
                       preferred_element_type=jnp.float32)      # (N, Oh, Tout)

    if residual:
        x = x + x0
    o_ref[...] = x.astype(o_ref.dtype)


# ------------------------------- wrapper -------------------------------------
def complex_conv_block(x, params, padding, skip_res=False):
    """params: list of (gamma (C_l,), beta (C_l,), W (Cout, C_l//2, K))."""
    N, C_in, T = x.shape
    L = len(params)
    Cout, _, K = params[-1][2].shape
    assert C_in % 2 == 0 and Cout % 2 == 0

    # per-layer time extents
    Ts = [T]
    for _ in range(L):
        Ts.append(Ts[-1] + 2 * padding - (K - 1))
    T_out = Ts[-1]
    residual = ((C_in, T) == (Cout, T_out)) and not skip_res

    # Split the channel axis into (2, C//2) so the Pallas grid tiles a leading
    # dim and every BlockSpec keeps its last two dims at full extent.
    x_g = x.reshape(N, 2, C_in // 2, T)

    flat_inputs = [x_g]
    in_specs = [pl.BlockSpec((N, None, C_in // 2, T), lambda g: (0, g, 0, 0))]
    for gamma, beta, W in params:
        C_l = gamma.shape[0]
        Cg_l = C_l // 2
        g_g = gamma.reshape(2, Cg_l, 1)
        b_g = beta.reshape(2, Cg_l, 1)
        # im2col weight: Wr[o, k*Cg + c] = W[o, c, k]; then split output groups.
        Wr = jnp.transpose(W, (0, 2, 1)).reshape(Cout, K * Cg_l)
        Wr_g = Wr.reshape(2, Cout // 2, K * Cg_l)
        flat_inputs += [g_g, b_g, Wr_g]
        in_specs += [
            pl.BlockSpec((None, Cg_l, 1), lambda g: (g, 0, 0)),
            pl.BlockSpec((None, Cg_l, 1), lambda g: (g, 0, 0)),
            pl.BlockSpec((None, Cout // 2, K * Cg_l), lambda g: (g, 0, 0)),
        ]

    Cg_max = max(p[0].shape[0] // 2 for p in params)
    Tpad_max = max(t + 2 * padding for t in Ts[:-1])

    kernel = functools.partial(_ccb_fused_kernel, n_layers=L, pad=padding,
                               ksize=K, residual=residual)
    out = pl.pallas_call(
        kernel,
        out_shape=jax.ShapeDtypeStruct((N, 2, Cout // 2, T_out), jnp.float32),
        grid_spec=pltpu.PrefetchScalarGridSpec(
            num_scalar_prefetch=0,
            grid=(2,),                                  # one program per conv group
            in_specs=in_specs,
            out_specs=pl.BlockSpec((N, None, Cout // 2, T_out),
                                   lambda g: (0, g, 0, 0)),
            scratch_shapes=[pltpu.VMEM((N, Cg_max, Tpad_max), jnp.float32)],
        ),
        compiler_params=pltpu.CompilerParams(
            dimension_semantics=("parallel",)),         # v7x: one group per TC
    )(*flat_inputs)
    return out.reshape(N, Cout, T_out)


# ------------------------------- module glue ---------------------------------
def make_params(key, layers, in_channels, out_channels, kernel_size):
    """Deterministic parameter init matching _ComplexConvNd.reset_parameters."""
    gain = math.sqrt(2.0)  # calculate_gain('leaky_relu', 0)
    params = []
    for idx in range(layers):
        in_ = in_channels if idx == 0 else out_channels
        fan_in = (in_ // 2) * kernel_size
        std = gain / math.sqrt(fan_in)
        bound = math.sqrt(3.0) * std
        key, ka, kb = jax.random.split(key, 3)
        A = jax.random.uniform(ka, (out_channels, in_ // 2, kernel_size),
                               jnp.float32, -bound / math.pi ** 2, bound / math.pi ** 2)
        B = jax.random.uniform(kb, (out_channels, in_ // 2, kernel_size),
                               jnp.float32, -1.0 / math.pi, 1.0 / math.pi)
        spl = in_ // 2
        wB = jnp.concatenate([-B[:spl], B[spl:]], axis=0)  # sign flip as in forward
        W = A + wB                                         # combine real + imag paths
        gamma = jnp.ones((in_,), jnp.float32)              # BatchNorm1d default weight
        beta = jnp.zeros((in_,), jnp.float32)              # BatchNorm1d default bias
        params.append((gamma, beta, W))
    return params


# ------------------------- pure-JAX reference (check) -------------------------
def _ref_block(x, params, padding, skip_res=False):
    temp = x
    for gamma, beta, W in params:
        mean = jnp.mean(x, axis=(0, 2), keepdims=True)
        var = jnp.mean((x - mean) ** 2, axis=(0, 2), keepdims=True)
        xn = (x - mean) / jnp.sqrt(var + 1e-5)
        xn = xn * gamma[None, :, None] + beta[None, :, None]
        xn = jnp.where(xn >= 0, xn, 0.01 * xn)
        if padding > 0:
            xn = jnp.pad(xn, ((0, 0), (0, 0), (padding, padding)), mode="reflect")
        x = jax.lax.conv_general_dilated(
            xn, W, window_strides=(1,), padding="VALID",
            dimension_numbers=("NCH", "OIH", "NCH"), feature_group_count=2)
    if temp.shape != x.shape or skip_res:
        return x
    return x + temp


if __name__ == "__main__":
    # small shapes: N=2, C_in=C_out=8 (4 real + 4 imag channels), T=16
    N, C_in, C_out, T = 2, 8, 8, 16
    kernel_size, padding, layers = 3, 1, 4

    key = jax.random.PRNGKey(0)
    kx, kp = jax.random.split(key)
    x = jax.random.normal(kx, (N, C_in, T), jnp.float32)
    params = make_params(kp, layers, C_in, C_out, kernel_size)

    out = jax.block_until_ready(complex_conv_block(x, params, padding))
    ref = jax.block_until_ready(_ref_block(x, params, padding))

    assert out.shape == ref.shape
    max_err = float(jnp.max(jnp.abs(out - ref)))
    assert jnp.allclose(out, ref, rtol=1e-4, atol=1e-4), f"max abs err {max_err}"

    print("KERNEL_OK")
</pallas_src>

<mosaic_0001>
module attributes {stable_mosaic.version = 11 : i64} {
  func.func @_ccb_fused_kernel(%arg0: i32, %arg1: memref<2x1x4x16xf32, #tpu.memory_space<vmem>>, %arg2: memref<1x4x1xf32, #tpu.memory_space<vmem>>, %arg3: memref<1x4x1xf32, #tpu.memory_space<vmem>>, %arg4: memref<1x4x12xf32, #tpu.memory_space<vmem>>, %arg5: memref<1x4x1xf32, #tpu.memory_space<vmem>>, %arg6: memref<1x4x1xf32, #tpu.memory_space<vmem>>, %arg7: memref<1x4x12xf32, #tpu.memory_space<vmem>>, %arg8: memref<1x4x1xf32, #tpu.memory_space<vmem>>, %arg9: memref<1x4x1xf32, #tpu.memory_space<vmem>>, %arg10: memref<1x4x12xf32, #tpu.memory_space<vmem>>, %arg11: memref<1x4x1xf32, #tpu.memory_space<vmem>>, %arg12: memref<1x4x1xf32, #tpu.memory_space<vmem>>, %arg13: memref<1x4x12xf32, #tpu.memory_space<vmem>>, %arg14: memref<2x1x4x16xf32, #tpu.memory_space<vmem>>, %arg15: memref<2x4x18xf32, #tpu.memory_space<vmem>>) attributes {dimension_semantics = [#tpu.dimension_semantics<parallel>], iteration_bounds = array<i64: 2>, scalar_prefetch = 0 : i64, scratch_operands = 1 : i64, tpu.core_type = #tpu.core_type<tc>, window_params = [{transform_indices = @transform_0, window_bounds = array<i64: 2, 1, 4, 16>}, {transform_indices = @transform_1, window_bounds = array<i64: 1, 4, 1>}, {transform_indices = @transform_2, window_bounds = array<i64: 1, 4, 1>}, {transform_indices = @transform_3, window_bounds = array<i64: 1, 4, 12>}, {transform_indices = @transform_4, window_bounds = array<i64: 1, 4, 1>}, {transform_indices = @transform_5, window_bounds = array<i64: 1, 4, 1>}, {transform_indices = @transform_6, window_bounds = array<i64: 1, 4, 12>}, {transform_indices = @transform_7, window_bounds = array<i64: 1, 4, 1>}, {transform_indices = @transform_8, window_bounds = array<i64: 1, 4, 1>}, {transform_indices = @transform_9, window_bounds = array<i64: 1, 4, 12>}, {transform_indices = @transform_10, window_bounds = array<i64: 1, 4, 1>}, {transform_indices = @transform_11, window_bounds = array<i64: 1, 4, 1>}, {transform_indices = @transform_12, window_bounds = array<i64: 1, 4, 12>}, {transform_indices = @transform_13, window_bounds = array<i64: 2, 1, 4, 16>}]} {
    %c0 = arith.constant 0 : index
    %c0_0 = arith.constant 0 : index
    %c0_1 = arith.constant 0 : index
    %c0_2 = arith.constant 0 : index
    %0 = vector.load %arg1[%c0, %c0_0, %c0_1, %c0_2] : memref<2x1x4x16xf32, #tpu.memory_space<vmem>>, vector<2x1x4x16xf32>
    %1 = vector.shape_cast %0 : vector<2x1x4x16xf32> to vector<2x4x16xf32>
    %c0_3 = arith.constant 0 : index
    %c0_4 = arith.constant 0 : index
    %c0_5 = arith.constant 0 : index
    %2 = vector.load %arg2[%c0_3, %c0_4, %c0_5] : memref<1x4x1xf32, #tpu.memory_space<vmem>>, vector<1x4x1xf32>
    %3 = vector.shape_cast %2 : vector<1x4x1xf32> to vector<4x1xf32>
    %c0_6 = arith.constant 0 : index
    %c0_7 = arith.constant 0 : index
    %c0_8 = arith.constant 0 : index
    %4 = vector.load %arg3[%c0_6, %c0_7, %c0_8] : memref<1x4x1xf32, #tpu.memory_space<vmem>>, vector<1x4x1xf32>
    %5 = vector.shape_cast %4 : vector<1x4x1xf32> to vector<4x1xf32>
    %c0_9 = arith.constant 0 : index
    %c0_10 = arith.constant 0 : index
    %c0_11 = arith.constant 0 : index
    %6 = vector.load %arg4[%c0_9, %c0_10, %c0_11] : memref<1x4x12xf32, #tpu.memory_space<vmem>>, vector<1x4x12xf32>
    %7 = vector.shape_cast %6 : vector<1x4x12xf32> to vector<4x12xf32>
    %cst = arith.constant dense<0.000000e+00> : vector<2x4xf32>
    %8 = vector.multi_reduction <add>, %1, %cst [2] : vector<2x4x16xf32> to vector<2x4xf32>
    %9 = vector.shape_cast %8 : vector<2x4xf32> to vector<2x4x1xf32>
    %cst_12 = arith.constant dense<0.000000e+00> : vector<4x1xf32>
    %10 = vector.multi_reduction <add>, %9, %cst_12 [0] : vector<2x4x1xf32> to vector<4x1xf32>
    %11 = vector.shape_cast %10 : vector<4x1xf32> to vector<1x4x1xf32>
    %cst_13 = arith.constant 3.125000e-02 : f32
    %12 = vector.broadcast %cst_13 : f32 to vector<1x4x1xf32>
    %13 = arith.mulf %11, %12 : vector<1x4x1xf32>
    %14 = vector.broadcast %13 : vector<1x4x1xf32> to vector<2x4x16xf32>
    %15 = arith.subf %1, %14 : vector<2x4x16xf32>
    %16 = arith.mulf %15, %15 : vector<2x4x16xf32>
    %cst_14 = arith.constant dense<0.000000e+00> : vector<2x4xf32>
    %17 = vector.multi_reduction <add>, %16, %cst_14 [2] : vector<2x4x16xf32> to vector<2x4xf32>
    %18 = vector.shape_cast %17 : vector<2x4xf32> to vector<2x4x1xf32>
    %cst_15 = arith.constant dense<0.000000e+00> : vector<4x1xf32>
    %19 = vector.multi_reduction <add>, %18, %cst_15 [0] : vector<2x4x1xf32> to vector<4x1xf32>
    %20 = vector.shape_cast %19 : vector<4x1xf32> to vector<1x4x1xf32>
    %cst_16 = arith.constant 3.125000e-02 : f32
    %21 = vector.broadcast %cst_16 : f32 to vector<1x4x1xf32>
    %22 = arith.mulf %20, %21 : vector<1x4x1xf32>
    %23 = vector.shape_cast %3 : vector<4x1xf32> to vector<1x4x1xf32>
    %cst_17 = arith.constant 9.99999974E-6 : f32
    %24 = vector.broadcast %cst_17 : f32 to vector<1x4x1xf32>
    %25 = arith.addf %22, %24 : vector<1x4x1xf32>
    %26 = math.rsqrt %25 : vector<1x4x1xf32>
    %27 = arith.mulf %23, %26 : vector<1x4x1xf32>
    %28 = vector.broadcast %27 : vector<1x4x1xf32> to vector<2x4x16xf32>
    %29 = arith.mulf %15, %28 : vector<2x4x16xf32>
    %30 = vector.shape_cast %5 : vector<4x1xf32> to vector<1x4x1xf32>
    %31 = vector.broadcast %30 : vector<1x4x1xf32> to vector<2x4x16xf32>
    %32 = arith.addf %29, %31 : vector<2x4x16xf32>
    %cst_18 = arith.constant 0.000000e+00 : f32
    %33 = vector.broadcast %cst_18 : f32 to vector<2x4x16xf32>
    %34 = arith.cmpf oge, %32, %33 : vector<2x4x16xf32>
    %cst_19 = arith.constant 0.00999999977 : f32
    %35 = vector.broadcast %cst_19 : f32 to vector<2x4x16xf32>
    %36 = arith.mulf %35, %32 : vector<2x4x16xf32>
    %37 = arith.select %34, %32, %36 : vector<2x4x16xi1>, vector<2x4x16xf32>
    %c0_20 = arith.constant 0 : index
    %c0_21 = arith.constant 0 : index
    %c1 = arith.constant 1 : index
    %38 = vector.load %arg15[%c0_20, %c0_21, %c1] : memref<2x4x18xf32, #tpu.memory_space<vmem>>, vector<2x4x16xf32>
    tpu.vector_store %arg15[%c0_20, %c0_21, %c1], %37 {strides = array<i32>} : memref<2x4x18xf32, #tpu.memory_space<vmem>>, vector<2x4x16xf32>,
    %39 = vector.extract_strided_slice %37 {offsets = [0, 0, 1], sizes = [2, 4, 1], strides = [1, 1, 1]} : vector<2x4x16xf32> to vector<2x4x1xf32>
    %c0_22 = arith.constant 0 : index
    %c0_23 = arith.constant 0 : index
    %c0_24 = arith.constant 0 : index
    %40 = vector.load %arg15[%c0_22, %c0_23, %c0_24] : memref<2x4x18xf32, #tpu.memory_space<vmem>>, vector<2x4x1xf32>
    tpu.vector_store %arg15[%c0_22, %c0_23, %c0_24], %39 {strides = array<i32>} : memref<2x4x18xf32, #tpu.memory_space<vmem>>, vector<2x4x1xf32>,
    %41 = vector.extract_strided_slice %37 {offsets = [0, 0, 14], sizes = [2, 4, 1], strides = [1, 1, 1]} : vector<2x4x16xf32> to vector<2x4x1xf32>
    %c0_25 = arith.constant 0 : index
    %c0_26 = arith.constant 0 : index
    %c17 = arith.constant 17 : index
    %42 = vector.load %arg15[%c0_25, %c0_26, %c17] : memref<2x4x18xf32, #tpu.memory_space<vmem>>, vector<2x4x1xf32>
    tpu.vector_store %arg15[%c0_25, %c0_26, %c17], %41 {strides = array<i32>} : memref<2x4x18xf32, #tpu.memory_space<vmem>>, vector<2x4x1xf32>,
    %c0_27 = arith.constant 0 : index
    %c0_28 = arith.constant 0 : index
    %c0_29 = arith.constant 0 : index
    %43 = vector.load %arg15[%c0_27, %c0_28, %c0_29] : memref<2x4x18xf32, #tpu.memory_space<vmem>>, vector<2x4x16xf32>
    %c0_30 = arith.constant 0 : index
    %c0_31 = arith.constant 0 : index
    %c1_32 = arith.constant 1 : index
    %44 = vector.load %arg15[%c0_30, %c0_31, %c1_32] : memref<2x4x18xf32, #tpu.memory_space<vmem>>, vector<2x4x16xf32>
    %c0_33 = arith.constant 0 : index
    %c0_34 = arith.constant 0 : index
    %c2 = arith.constant 2 : index
    %45 = vector.load %arg15[%c0_33, %c0_34, %c2] : memref<2x4x18xf32, #tpu.memory_space<vmem>>, vector<2x4x16xf32>
    %46 = tpu.concatenate %43, %44, %45 in 1 : vector<2x4x16xf32>, vector<2x4x16xf32>, vector<2x4x16xf32> -> vector<2x12x16xf32>
    %47 = vector.shape_cast %7 : vector<4x12xf32> to vector<1x4x12xf32>
    %48 = vector.shape_cast %47 : vector<1x4x12xf32> to vector<1x4x12xf32>
    %49 = vector.broadcast %48 : vector<1x4x12xf32> to vector<2x4x12xf32>
    "tpu.trace_start"() <{level = 10 : i32, message = "nom,nmt->not"}> : () -> ()
    %cst_35 = arith.constant dense<0.000000e+00> : vector<2x4x16xf32>
    %50 = tpu.matmul %49, %46, %cst_35 {dimension_numbers = #tpu.dot_dimension_numbers<[2], [1], [1], [2], [0, 0, 0, 1, 1, 2], [0], [0]>} : vector<2x4x12xf32>, vector<2x12x16xf32>, vector<2x4x16xf32> -> vector<2x4x16xf32>
    "tpu.trace_stop"() : () -> ()
    %c0_36 = arith.constant 0 : index
    %c0_37 = arith.constant 0 : index
    %c0_38 = arith.constant 0 : index
    %51 = vector.load %arg5[%c0_36, %c0_37, %c0_38] : memref<1x4x1xf32, #tpu.memory_space<vmem>>, vector<1x4x1xf32>
    %52 = vector.shape_cast %51 : vector<1x4x1xf32> to vector<4x1xf32>
    %c0_39 = arith.constant 0 : index
    %c0_40 = arith.constant 0 : index
    %c0_41 = arith.constant 0 : index
    %53 = vector.load %arg6[%c0_39, %c0_40, %c0_41] : memref<1x4x1xf32, #tpu.memory_space<vmem>>, vector<1x4x1xf32>
    %54 = vector.shape_cast %53 : vector<1x4x1xf32> to vector<4x1xf32>
    %c0_42 = arith.constant 0 : index
    %c0_43 = arith.constant 0 : index
    %c0_44 = arith.constant 0 : index
    %55 = vector.load %arg7[%c0_42, %c0_43, %c0_44] : memref<1x4x12xf32, #tpu.memory_space<vmem>>, vector<1x4x12xf32>
    %56 = vector.shape_cast %55 : vector<1x4x12xf32> to vector<4x12xf32>
    %cst_45 = arith.constant dense<0.000000e+00> : vector<2x4xf32>
    %57 = vector.multi_reduction <add>, %50, %cst_45 [2] : vector<2x4x16xf32> to vector<2x4xf32>
    %58 = vector.shape_cast %57 : vector<2x4xf32> to vector<2x4x1xf32>
    %cst_46 = arith.constant dense<0.000000e+00> : vector<4x1xf32>
    %59 = vector.multi_reduction <add>, %58, %cst_46 [0] : vector<2x4x1xf32> to vector<4x1xf32>
    %60 = vector.shape_cast %59 : vector<4x1xf32> to vector<1x4x1xf32>
    %cst_47 = arith.constant 3.125000e-02 : f32
    %61 = vector.broadcast %cst_47 : f32 to vector<1x4x1xf32>
    %62 = arith.mulf %60, %61 : vector<1x4x1xf32>
    %63 = vector.broadcast %62 : vector<1x4x1xf32> to vector<2x4x16xf32>
    %64 = arith.subf %50, %63 : vector<2x4x16xf32>
    %65 = arith.mulf %64, %64 : vector<2x4x16xf32>
    %cst_48 = arith.constant dense<0.000000e+00> : vector<2x4xf32>
    %66 = vector.multi_reduction <add>, %65, %cst_48 [2] : vector<2x4x16xf32> to vector<2x4xf32>
    %67 = vector.shape_cast %66 : vector<2x4xf32> to vector<2x4x1xf32>
    %cst_49 = arith.constant dense<0.000000e+00> : vector<4x1xf32>
    %68 = vector.multi_reduction <add>, %67, %cst_49 [0] : vector<2x4x1xf32> to vector<4x1xf32>
    %69 = vector.shape_cast %68 : vector<4x1xf32> to vector<1x4x1xf32>
    %cst_50 = arith.constant 3.125000e-02 : f32
    %70 = vector.broadcast %cst_50 : f32 to vector<1x4x1xf32>
    %71 = arith.mulf %69, %70 : vector<1x4x1xf32>
    %72 = vector.shape_cast %52 : vector<4x1xf32> to vector<1x4x1xf32>
    %cst_51 = arith.constant 9.99999974E-6 : f32
    %73 = vector.broadcast %cst_51 : f32 to vector<1x4x1xf32>
    %74 = arith.addf %71, %73 : vector<1x4x1xf32>
    %75 = math.rsqrt %74 : vector<1x4x1xf32>
    %76 = arith.mulf %72, %75 : vector<1x4x1xf32>
    %77 = vector.broadcast %76 : vector<1x4x1xf32> to vector<2x4x16xf32>
    %78 = arith.mulf %64, %77 : vector<2x4x16xf32>
    %79 = vector.shape_cast %54 : vector<4x1xf32> to vector<1x4x1xf32>
    %80 = vector.broadcast %79 : vector<1x4x1xf32> to vector<2x4x16xf32>
    %81 = arith.addf %78, %80 : vector<2x4x16xf32>
    %cst_52 = arith.constant 0.000000e+00 : f32
    %82 = vector.broadcast %cst_52 : f32 to vector<2x4x16xf32>
    %83 = arith.cmpf oge, %81, %82 : vector<2x4x16xf32>
    %cst_53 = arith.constant 0.00999999977 : f32
    %84 = vector.broadcast %cst_53 : f32 to vector<2x4x16xf32>
    %85 = arith.mulf %84, %81 : vector<2x4x16xf32>
    %86 = arith.select %83, %81, %85 : vector<2x4x16xi1>, vector<2x4x16xf32>
    %c0_54 = arith.constant 0 : index
    %c0_55 = arith.constant 0 : index
    %c1_56 = arith.constant 1 : index
    %87 = vector.load %arg15[%c0_54, %c0_55, %c1_56] : memref<2x4x18xf32, #tpu.memory_space<vmem>>, vector<2x4x16xf32>
    tpu.vector_store %arg15[%c0_54, %c0_55, %c1_56], %86 {strides = array<i32>} : memref<2x4x18xf32, #tpu.memory_space<vmem>>, vector<2x4x16xf32>,
    %88 = vector.extract_strided_slice %86 {offsets = [0, 0, 1], sizes = [2, 4, 1], strides = [1, 1, 1]} : vector<2x4x16xf32> to vector<2x4x1xf32>
    %c0_57 = arith.constant 0 : index
    %c0_58 = arith.constant 0 : index
    %c0_59 = arith.constant 0 : index
    %89 = vector.load %arg15[%c0_57, %c0_58, %c0_59] : memref<2x4x18xf32, #tpu.memory_space<vmem>>, vector<2x4x1xf32>
    tpu.vector_store %arg15[%c0_57, %c0_58, %c0_59], %88 {strides = array<i32>} : memref<2x4x18xf32, #tpu.memory_space<vmem>>, vector<2x4x1xf32>,
    %90 = vector.extract_strided_slice %86 {offsets = [0, 0, 14], sizes = [2, 4, 1], strides = [1, 1, 1]} : vector<2x4x16xf32> to vector<2x4x1xf32>
    %c0_60 = arith.constant 0 : index
    %c0_61 = arith.constant 0 : index
    %c17_62 = arith.constant 17 : index
    %91 = vector.load %arg15[%c0_60, %c0_61, %c17_62] : memref<2x4x18xf32, #tpu.memory_space<vmem>>, vector<2x4x1xf32>
    tpu.vector_store %arg15[%c0_60, %c0_61, %c17_62], %90 {strides = array<i32>} : memref<2x4x18xf32, #tpu.memory_space<vmem>>, vector<2x4x1xf32>,
    %c0_63 = arith.constant 0 : index
    %c0_64 = arith.constant 0 : index
    %c0_65 = arith.constant 0 : index
    %92 = vector.load %arg15[%c0_63, %c0_64, %c0_65] : memref<2x4x18xf32, #tpu.memory_space<vmem>>, vector<2x4x16xf32>
    %c0_66 = arith.constant 0 : index
    %c0_67 = arith.constant 0 : index
    %c1_68 = arith.constant 1 : index
    %93 = vector.load %arg15[%c0_66, %c0_67, %c1_68] : memref<2x4x18xf32, #tpu.memory_space<vmem>>, vector<2x4x16xf32>
    %c0_69 = arith.constant 0 : index
    %c0_70 = arith.constant 0 : index
    %c2_71 = arith.constant 2 : index
    %94 = vector.load %arg15[%c0_69, %c0_70, %c2_71] : memref<2x4x18xf32, #tpu.memory_space<vmem>>, vector<2x4x16xf32>
    %95 = tpu.concatenate %92, %93, %94 in 1 : vector<2x4x16xf32>, vector<2x4x16xf32>, vector<2x4x16xf32> -> vector<2x12x16xf32>
    %96 = vector.shape_cast %56 : vector<4x12xf32> to vector<1x4x12xf32>
    %97 = vector.shape_cast %96 : vector<1x4x12xf32> to vector<1x4x12xf32>
    %98 = vector.broadcast %97 : vector<1x4x12xf32> to vector<2x4x12xf32>
    "tpu.trace_start"() <{level = 10 : i32, message = "nom,nmt->not"}> : () -> ()
    %cst_72 = arith.constant dense<0.000000e+00> : vector<2x4x16xf32>
    %99 = tpu.matmul %98, %95, %cst_72 {dimension_numbers = #tpu.dot_dimension_numbers<[2], [1], [1], [2], [0, 0, 0, 1, 1, 2], [0], [0]>} : vector<2x4x12xf32>, vector<2x12x16xf32>, vector<2x4x16xf32> -> vector<2x4x16xf32>
    "tpu.trace_stop"() : () -> ()
    %c0_73 = arith.constant 0 : index
    %c0_74 = arith.constant 0 : index
    %c0_75 = arith.constant 0 : index
    %100 = vector.load %arg8[%c0_73, %c0_74, %c0_75] : memref<1x4x1xf32, #tpu.memory_space<vmem>>, vector<1x4x1xf32>
    %101 = vector.shape_cast %100 : vector<1x4x1xf32> to vector<4x1xf32>
    %c0_76 = arith.constant 0 : index
    %c0_77 = arith.constant 0 : index
    %c0_78 = arith.constant 0 : index
    %102 = vector.load %arg9[%c0_76, %c0_77, %c0_78] : memref<1x4x1xf32, #tpu.memory_space<vmem>>, vector<1x4x1xf32>
    %103 = vector.shape_cast %102 : vector<1x4x1xf32> to vector<4x1xf32>
    %c0_79 = arith.constant 0 : index
    %c0_80 = arith.constant 0 : index
    %c0_81 = arith.constant 0 : index
    %104 = vector.load %arg10[%c0_79, %c0_80, %c0_81] : memref<1x4x12xf32, #tpu.memory_space<vmem>>, vector<1x4x12xf32>
    %105 = vector.shape_cast %104 : vector<1x4x12xf32> to vector<4x12xf32>
    %cst_82 = arith.constant dense<0.000000e+00> : vector<2x4xf32>
    %106 = vector.multi_reduction <add>, %99, %cst_82 [2] : vector<2x4x16xf32> to vector<2x4xf32>
    %107 = vector.shape_cast %106 : vector<2x4xf32> to vector<2x4x1xf32>
    %cst_83 = arith.constant dense<0.000000e+00> : vector<4x1xf32>
    %108 = vector.multi_reduction <add>, %107, %cst_83 [0] : vector<2x4x1xf32> to vector<4x1xf32>
    %109 = vector.shape_cast %108 : vector<4x1xf32> to vector<1x4x1xf32>
    %cst_84 = arith.constant 3.125000e-02 : f32
    %110 = vector.broadcast %cst_84 : f32 to vector<1x4x1xf32>
    %111 = arith.mulf %109, %110 : vector<1x4x1xf32>
    %112 = vector.broadcast %111 : vector<1x4x1xf32> to vector<2x4x16xf32>
    %113 = arith.subf %99, %112 : vector<2x4x16xf32>
    %114 = arith.mulf %113, %113 : vector<2x4x16xf32>
    %cst_85 = arith.constant dense<0.000000e+00> : vector<2x4xf32>
    %115 = vector.multi_reduction <add>, %114, %cst_85 [2] : vector<2x4x16xf32> to vector<2x4xf32>
    %116 = vector.shape_cast %115 : vector<2x4xf32> to vector<2x4x1xf32>
    %cst_86 = arith.constant dense<0.000000e+00> : vector<4x1xf32>
    %117 = vector.multi_reduction <add>, %116, %cst_86 [0] : vector<2x4x1xf32> to vector<4x1xf32>
    %118 = vector.shape_cast %117 : vector<4x1xf32> to vector<1x4x1xf32>
    %cst_87 = arith.constant 3.125000e-02 : f32
    %119 = vector.broadcast %cst_87 : f32 to vector<1x4x1xf32>
    %120 = arith.mulf %118, %119 : vector<1x4x1xf32>
    %121 = vector.shape_cast %101 : vector<4x1xf32> to vector<1x4x1xf32>
    %cst_88 = arith.constant 9.99999974E-6 : f32
    %122 = vector.broadcast %cst_88 : f32 to vector<1x4x1xf32>
    %123 = arith.addf %120, %122 : vector<1x4x1xf32>
    %124 = math.rsqrt %123 : vector<1x4x1xf32>
    %125 = arith.mulf %121, %124 : vector<1x4x1xf32>
    %126 = vector.broadcast %125 : vector<1x4x1xf32> to vector<2x4x16xf32>
    %127 = arith.mulf %113, %126 : vector<2x4x16xf32>
    %128 = vector.shape_cast %103 : vector<4x1xf32> to vector<1x4x1xf32>
    %129 = vector.broadcast %128 : vector<1x4x1xf32> to vector<2x4x16xf32>
    %130 = arith.addf %127, %129 : vector<2x4x16xf32>
    %cst_89 = arith.constant 0.000000e+00 : f32
    %131 = vector.broadcast %cst_89 : f32 to vector<2x4x16xf32>
    %132 = arith.cmpf oge, %130, %131 : vector<2x4x16xf32>
    %cst_90 = arith.constant 0.00999999977 : f32
    %133 = vector.broadcast %cst_90 : f32 to vector<2x4x16xf32>
    %134 = arith.mulf %133, %130 : vector<2x4x16xf32>
    %135 = arith.select %132, %130, %134 : vector<2x4x16xi1>, vector<2x4x16xf32>
    %c0_91 = arith.constant 0 : index
    %c0_92 = arith.constant 0 : index
    %c1_93 = arith.constant 1 : index
    %136 = vector.load %arg15[%c0_91, %c0_92, %c1_93] : memref<2x4x18xf32, #tpu.memory_space<vmem>>, vector<2x4x16xf32>
    tpu.vector_store %arg15[%c0_91, %c0_92, %c1_93], %135 {strides = array<i32>} : memref<2x4x18xf32, #tpu.memory_space<vmem>>, vector<2x4x16xf32>,
    %137 = vector.extract_strided_slice %135 {offsets = [0, 0, 1], sizes = [2, 4, 1], strides = [1, 1, 1]} : vector<2x4x16xf32> to vector<2x4x1xf32>
    %c0_94 = arith.constant 0 : index
    %c0_95 = arith.constant 0 : index
    %c0_96 = arith.constant 0 : index
    %138 = vector.load %arg15[%c0_94, %c0_95, %c0_96] : memref<2x4x18xf32, #tpu.memory_space<vmem>>, vector<2x4x1xf32>
    tpu.vector_store %arg15[%c0_94, %c0_95, %c0_96], %137 {strides = array<i32>} : memref<2x4x18xf32, #tpu.memory_space<vmem>>, vector<2x4x1xf32>,
    %139 = vector.extract_strided_slice %135 {offsets = [0, 0, 14], sizes = [2, 4, 1], strides = [1, 1, 1]} : vector<2x4x16xf32> to vector<2x4x1xf32>
    %c0_97 = arith.constant 0 : index
    %c0_98 = arith.constant 0 : index
    %c17_99 = arith.constant 17 : index
    %140 = vector.load %arg15[%c0_97, %c0_98, %c17_99] : memref<2x4x18xf32, #tpu.memory_space<vmem>>, vector<2x4x1xf32>
    tpu.vector_store %arg15[%c0_97, %c0_98, %c17_99], %139 {strides = array<i32>} : memref<2x4x18xf32, #tpu.memory_space<vmem>>, vector<2x4x1xf32>,
    %c0_100 = arith.constant 0 : index
    %c0_101 = arith.constant 0 : index
    %c0_102 = arith.constant 0 : index
    %141 = vector.load %arg15[%c0_100, %c0_101, %c0_102] : memref<2x4x18xf32, #tpu.memory_space<vmem>>, vector<2x4x16xf32>
    %c0_103 = arith.constant 0 : index
    %c0_104 = arith.constant 0 : index
    %c1_105 = arith.constant 1 : index
    %142 = vector.load %arg15[%c0_103, %c0_104, %c1_105] : memref<2x4x18xf32, #tpu.memory_space<vmem>>, vector<2x4x16xf32>
    %c0_106 = arith.constant 0 : index
    %c0_107 = arith.constant 0 : index
    %c2_108 = arith.constant 2 : index
    %143 = vector.load %arg15[%c0_106, %c0_107, %c2_108] : memref<2x4x18xf32, #tpu.memory_space<vmem>>, vector<2x4x16xf32>
    %144 = tpu.concatenate %141, %142, %143 in 1 : vector<2x4x16xf32>, vector<2x4x16xf32>, vector<2x4x16xf32> -> vector<2x12x16xf32>
    %145 = vector.shape_cast %105 : vector<4x12xf32> to vector<1x4x12xf32>
    %146 = vector.shape_cast %145 : vector<1x4x12xf32> to vector<1x4x12xf32>
    %147 = vector.broadcast %146 : vector<1x4x12xf32> to vector<2x4x12xf32>
    "tpu.trace_start"() <{level = 10 : i32, message = "nom,nmt->not"}> : () -> ()
    %cst_109 = arith.constant dense<0.000000e+00> : vector<2x4x16xf32>
    %148 = tpu.matmul %147, %144, %cst_109 {dimension_numbers = #tpu.dot_dimension_numbers<[2], [1], [1], [2], [0, 0, 0, 1, 1, 2], [0], [0]>} : vector<2x4x12xf32>, vector<2x12x16xf32>, vector<2x4x16xf32> -> vector<2x4x16xf32>
    "tpu.trace_stop"() : () -> ()
    %c0_110 = arith.constant 0 : index
    %c0_111 = arith.constant 0 : index
    %c0_112 = arith.constant 0 : index
    %149 = vector.load %arg11[%c0_110, %c0_111, %c0_112] : memref<1x4x1xf32, #tpu.memory_space<vmem>>, vector<1x4x1xf32>
    %150 = vector.shape_cast %149 : vector<1x4x1xf32> to vector<4x1xf32>
    %c0_113 = arith.constant 0 : index
    %c0_114 = arith.constant 0 : index
    %c0_115 = arith.constant 0 : index
    %151 = vector.load %arg12[%c0_113, %c0_114, %c0_115] : memref<1x4x1xf32, #tpu.memory_space<vmem>>, vector<1x4x1xf32>
    %152 = vector.shape_cast %151 : vector<1x4x1xf32> to vector<4x1xf32>
    %c0_116 = arith.constant 0 : index
    %c0_117 = arith.constant 0 : index
    %c0_118 = arith.constant 0 : index
    %153 = vector.load %arg13[%c0_116, %c0_117, %c0_118] : memref<1x4x12xf32, #tpu.memory_space<vmem>>, vector<1x4x12xf32>
    %154 = vector.shape_cast %153 : vector<1x4x12xf32> to vector<4x12xf32>
    %cst_119 = arith.constant dense<0.000000e+00> : vector<2x4xf32>
    %155 = vector.multi_reduction <add>, %148, %cst_119 [2] : vector<2x4x16xf32> to vector<2x4xf32>
    %156 = vector.shape_cast %155 : vector<2x4xf32> to vector<2x4x1xf32>
    %cst_120 = arith.constant dense<0.000000e+00> : vector<4x1xf32>
    %157 = vector.multi_reduction <add>, %156, %cst_120 [0] : vector<2x4x1xf32> to vector<4x1xf32>
    %158 = vector.shape_cast %157 : vector<4x1xf32> to vector<1x4x1xf32>
    %cst_121 = arith.constant 3.125000e-02 : f32
    %159 = vector.broadcast %cst_121 : f32 to vector<1x4x1xf32>
    %160 = arith.mulf %158, %159 : vector<1x4x1xf32>
    %161 = vector.broadcast %160 : vector<1x4x1xf32> to vector<2x4x16xf32>
    %162 = arith.subf %148, %161 : vector<2x4x16xf32>
    %163 = arith.mulf %162, %162 : vector<2x4x16xf32>
    %cst_122 = arith.constant dense<0.000000e+00> : vector<2x4xf32>
    %164 = vector.multi_reduction <add>, %163, %cst_122 [2] : vector<2x4x16xf32> to vector<2x4xf32>
    %165 = vector.shape_cast %164 : vector<2x4xf32> to vector<2x4x1xf32>
    %cst_123 = arith.constant dense<0.000000e+00> : vector<4x1xf32>
    %166 = vector.multi_reduction <add>, %165, %cst_123 [0] : vector<2x4x1xf32> to vector<4x1xf32>
    %167 = vector.shape_cast %166 : vector<4x1xf32> to vector<1x4x1xf32>
    %cst_124 = arith.constant 3.125000e-02 : f32
    %168 = vector.broadcast %cst_124 : f32 to vector<1x4x1xf32>
    %169 = arith.mulf %167, %168 : vector<1x4x1xf32>
    %170 = vector.shape_cast %150 : vector<4x1xf32> to vector<1x4x1xf32>
    %cst_125 = arith.constant 9.99999974E-6 : f32
    %171 = vector.broadcast %cst_125 : f32 to vector<1x4x1xf32>
    %172 = arith.addf %169, %171 : vector<1x4x1xf32>
    %173 = math.rsqrt %172 : vector<1x4x1xf32>
    %174 = arith.mulf %170, %173 : vector<1x4x1xf32>
    %175 = vector.broadcast %174 : vector<1x4x1xf32> to vector<2x4x16xf32>
    %176 = arith.mulf %162, %175 : vector<2x4x16xf32>
    %177 = vector.shape_cast %152 : vector<4x1xf32> to vector<1x4x1xf32>
    %178 = vector.broadcast %177 : vector<1x4x1xf32> to vector<2x4x16xf32>
    %179 = arith.addf %176, %178 : vector<2x4x16xf32>
    %cst_126 = arith.constant 0.000000e+00 : f32
    %180 = vector.broadcast %cst_126 : f32 to vector<2x4x16xf32>
    %181 = arith.cmpf oge, %179, %180 : vector<2x4x16xf32>
    %cst_127 = arith.constant 0.00999999977 : f32
    %182 = vector.broadcast %cst_127 : f32 to vector<2x4x16xf32>
    %183 = arith.mulf %182, %179 : vector<2x4x16xf32>
    %184 = arith.select %181, %179, %183 : vector<2x4x16xi1>, vector<2x4x16xf32>
    %c0_128 = arith.constant 0 : index
    %c0_129 = arith.constant 0 : index
    %c1_130 = arith.constant 1 : index
    %185 = vector.load %arg15[%c0_128, %c0_129, %c1_130] : memref<2x4x18xf32, #tpu.memory_space<vmem>>, vector<2x4x16xf32>
    tpu.vector_store %arg15[%c0_128, %c0_129, %c1_130], %184 {strides = array<i32>} : memref<2x4x18xf32, #tpu.memory_space<vmem>>, vector<2x4x16xf32>,
    %186 = vector.extract_strided_slice %184 {offsets = [0, 0, 1], sizes = [2, 4, 1], strides = [1, 1, 1]} : vector<2x4x16xf32> to vector<2x4x1xf32>
    %c0_131 = arith.constant 0 : index
    %c0_132 = arith.constant 0 : index
    %c0_133 = arith.constant 0 : index
    %187 = vector.load %arg15[%c0_131, %c0_132, %c0_133] : memref<2x4x18xf32, #tpu.memory_space<vmem>>, vector<2x4x1xf32>
    tpu.vector_store %arg15[%c0_131, %c0_132, %c0_133], %186 {strides = array<i32>} : memref<2x4x18xf32, #tpu.memory_space<vmem>>, vector<2x4x1xf32>,
    %188 = vector.extract_strided_slice %184 {offsets = [0, 0, 14], sizes = [2, 4, 1], strides = [1, 1, 1]} : vector<2x4x16xf32> to vector<2x4x1xf32>
    %c0_134 = arith.constant 0 : index
    %c0_135 = arith.constant 0 : index
    %c17_136 = arith.constant 17 : index
    %189 = vector.load %arg15[%c0_134, %c0_135, %c17_136] : memref<2x4x18xf32, #tpu.memory_space<vmem>>, vector<2x4x1xf32>
    tpu.vector_store %arg15[%c0_134, %c0_135, %c17_136], %188 {strides = array<i32>} : memref<2x4x18xf32, #tpu.memory_space<vmem>>, vector<2x4x1xf32>,
    %c0_137 = arith.constant 0 : index
    %c0_138 = arith.constant 0 : index
    %c0_139 = arith.constant 0 : index
    %190 = vector.load %arg15[%c0_137, %c0_138, %c0_139] : memref<2x4x18xf32, #tpu.memory_space<vmem>>, vector<2x4x16xf32>
    %c0_140 = arith.constant 0 : index
    %c0_141 = arith.constant 0 : index
    %c1_142 = arith.constant 1 : index
    %191 = vector.load %arg15[%c0_140, %c0_141, %c1_142] : memref<2x4x18xf32, #tpu.memory_space<vmem>>, vector<2x4x16xf32>
    %c0_143 = arith.constant 0 : index
    %c0_144 = arith.constant 0 : index
    %c2_145 = arith.constant 2 : index
    %192 = vector.load %arg15[%c0_143, %c0_144, %c2_145] : memref<2x4x18xf32, #tpu.memory_space<vmem>>, vector<2x4x16xf32>
    %193 = tpu.concatenate %190, %191, %192 in 1 : vector<2x4x16xf32>, vector<2x4x16xf32>, vector<2x4x16xf32> -> vector<2x12x16xf32>
    %194 = vector.shape_cast %154 : vector<4x12xf32> to vector<1x4x12xf32>
    %195 = vector.shape_cast %194 : vector<1x4x12xf32> to vector<1x4x12xf32>
    %196 = vector.broadcast %195 : vector<1x4x12xf32> to vector<2x4x12xf32>
    "tpu.trace_start"() <{level = 10 : i32, message = "nom,nmt->not"}> : () -> ()
    %cst_146 = arith.constant dense<0.000000e+00> : vector<2x4x16xf32>
    %197 = tpu.matmul %196, %193, %cst_146 {dimension_numbers = #tpu.dot_dimension_numbers<[2], [1], [1], [2], [0, 0, 0, 1, 1, 2], [0], [0]>} : vector<2x4x12xf32>, vector<2x12x16xf32>, vector<2x4x16xf32> -> vector<2x4x16xf32>
    "tpu.trace_stop"() : () -> ()
    %198 = arith.addf %197, %1 : vector<2x4x16xf32>
    %c0_147 = arith.constant 0 : index
    %c0_148 = arith.constant 0 : index
    %c0_149 = arith.constant 0 : index
    %c0_150 = arith.constant 0 : index
    %199 = vector.load %arg14[%c0_147, %c0_148, %c0_149, %c0_150] : memref<2x1x4x16xf32, #tpu.memory_space<vmem>>, vector<2x1x4x16xf32>
    %200 = vector.shape_cast %199 : vector<2x1x4x16xf32> to vector<2x4x16xf32>
    %201 = vector.shape_cast %198 : vector<2x4x16xf32> to vector<2x1x4x16xf32>
    tpu.vector_store %arg14[%c0_147, %c0_148, %c0_149, %c0_150], %201 {strides = array<i32>} : memref<2x1x4x16xf32, #tpu.memory_space<vmem>>, vector<2x1x4x16xf32>,
    return
  }
  func.func @transform_0(%arg0: i32) -> (i32, i32, i32, i32) {
    %c0_i32 = arith.constant 0 : i32
    %c0_i32_0 = arith.constant 0 : i32
    %c0_i32_1 = arith.constant 0 : i32
    %c0_i32_2 = arith.constant 0 : i32
    return %c0_i32, %arg0, %c0_i32_0, %c0_i32_1 : i32, i32, i32, i32
  }
  func.func @transform_1(%arg0: i32) -> (i32, i32, i32) {
    %c0_i32 = arith.constant 0 : i32
    %c0_i32_0 = arith.constant 0 : i32
    %c0_i32_1 = arith.constant 0 : i32
    return %arg0, %c0_i32, %c0_i32_0 : i32, i32, i32
  }
  func.func @transform_2(%arg0: i32) -> (i32, i32, i32) {
    %c0_i32 = arith.constant 0 : i32
    %c0_i32_0 = arith.constant 0 : i32
    %c0_i32_1 = arith.constant 0 : i32
    return %arg0, %c0_i32, %c0_i32_0 : i32, i32, i32
  }
  func.func @transform_3(%arg0: i32) -> (i32, i32, i32) {
    %c0_i32 = arith.constant 0 : i32
    %c0_i32_0 = arith.constant 0 : i32
    %c0_i32_1 = arith.constant 0 : i32
    return %arg0, %c0_i32, %c0_i32_0 : i32, i32, i32
  }
  func.func @transform_4(%arg0: i32) -> (i32, i32, i32) {
    %c0_i32 = arith.constant 0 : i32
    %c0_i32_0 = arith.constant 0 : i32
    %c0_i32_1 = arith.constant 0 : i32
    return %arg0, %c0_i32, %c0_i32_0 : i32, i32, i32
  }
  func.func @transform_5(%arg0: i32) -> (i32, i32, i32) {
    %c0_i32 = arith.constant 0 : i32
    %c0_i32_0 = arith.constant 0 : i32
    %c0_i32_1 = arith.constant 0 : i32
    return %arg0, %c0_i32, %c0_i32_0 : i32, i32, i32
  }
  func.func @transform_6(%arg0: i32) -> (i32, i32, i32) {
    %c0_i32 = arith.constant 0 : i32
    %c0_i32_0 = arith.constant 0 : i32
    %c0_i32_1 = arith.constant 0 : i32
    return %arg0, %c0_i32, %c0_i32_0 : i32, i32, i32
  }
  func.func @transform_7(%arg0: i32) -> (i32, i32, i32) {
    %c0_i32 = arith.constant 0 : i32
    %c0_i32_0 = arith.constant 0 : i32
    %c0_i32_1 = arith.constant 0 : i32
    return %arg0, %c0_i32, %c0_i32_0 : i32, i32, i32
  }
  func.func @transform_8(%arg0: i32) -> (i32, i32, i32) {
    %c0_i32 = arith.constant 0 : i32
    %c0_i32_0 = arith.constant 0 : i32
    %c0_i32_1 = arith.constant 0 : i32
    return %arg0, %c0_i32, %c0_i32_0 : i32, i32, i32
  }
  func.func @transform_9(%arg0: i32) -> (i32, i32, i32) {
    %c0_i32 = arith.constant 0 : i32
    %c0_i32_0 = arith.constant 0 : i32
    %c0_i32_1 = arith.constant 0 : i32
    return %arg0, %c0_i32, %c0_i32_0 : i32, i32, i32
  }
  func.func @transform_10(%arg0: i32) -> (i32, i32, i32) {
    %c0_i32 = arith.constant 0 : i32
    %c0_i32_0 = arith.constant 0 : i32
    %c0_i32_1 = arith.constant 0 : i32
    return %arg0, %c0_i32, %c0_i32_0 : i32, i32, i32
  }
  func.func @transform_11(%arg0: i32) -> (i32, i32, i32) {
    %c0_i32 = arith.constant 0 : i32
    %c0_i32_0 = arith.constant 0 : i32
    %c0_i32_1 = arith.constant 0 : i32
    return %arg0, %c0_i32, %c0_i32_0 : i32, i32, i32
  }
  func.func @transform_12(%arg0: i32) -> (i32, i32, i32) {
    %c0_i32 = arith.constant 0 : i32
    %c0_i32_0 = arith.constant 0 : i32
    %c0_i32_1 = arith.constant 0 : i32
    return %arg0, %c0_i32, %c0_i32_0 : i32, i32, i32
  }
  func.func @transform_13(%arg0: i32) -> (i32, i32, i32, i32) {
    %c0_i32 = arith.constant 0 : i32
    %c0_i32_0 = arith.constant 0 : i32
    %c0_i32_1 = arith.constant 0 : i32
    %c0_i32_2 = arith.constant 0 : i32
    return %c0_i32, %arg0, %c0_i32_0, %c0_i32_1 : i32, i32, i32, i32
  }
}

</mosaic_0001>

<bundles_post_ra>
// kernel: tpu_custom_call.1
= control target key start
LH: loop header
LB: loop body
LE: loop exit
PB: predicated region body
PF: predicated region fallthrough
CT: control target
= control target key end

     0   :  { %s2065_s0 = inlined_call_operand.vmem [shape: f32[2,2,4,16], index: 0, kind: input, shape index: {}]   ;;  %s2066_s1 = inlined_call_operand.vmem [shape: f32[2,4,1], index: 1, kind: input, shape index: {}]   ;;  %s2067_s2 = inlined_call_operand.vmem [shape: f32[2,4,1], index: 2, kind: input, shape index: {}]   ;;  %s2068_s3 = inlined_call_operand.vmem [shape: f32[2,4,12], index: 3, kind: input, shape index: {}]   ;;  %s2069_s4 = inlined_call_operand.vmem [shape: f32[2,4,1], index: 4, kind: input, shape index: {}]   ;;  %s2070_s5 = inlined_call_operand.vmem [shape: f32[2,4,1], index: 5, kind: input, shape index: {}]   ;;  %s2071_s6 = inlined_call_operand.vmem [shape: f32[2,4,12], index: 6, kind: input, shape index: {}]   ;;  %s2072_s7 = inlined_call_operand.vmem [shape: f32[2,4,1], index: 7, kind: input, shape index: {}]   ;;  %s2073_s8 = inlined_call_operand.vmem [shape: f32[2,4,1], index: 8, kind: input, shape index: {}]   ;;  %s2074_s9 = inlined_call_operand.vmem [shape: f32[2,4,12], index: 9, kind: input, shape index: {}]   ;;  %s2075_s10 = inlined_call_operand.vmem [shape: f32[2,4,1], index: 10, kind: input, shape index: {}]   ;;  %s2076_s11 = inlined_call_operand.vmem [shape: f32[2,4,1], index: 11, kind: input, shape index: {}]   ;;  %s2077_s12 = inlined_call_operand.vmem [shape: f32[2,4,12], index: 12, kind: input, shape index: {}]   ;;  %s2078_s13 = inlined_call_operand.hbm [shape: f32[2,2,4,16], index: 13, kind: output, shape index: {}]  }
   0x1   :  { %2088 = sst [smem:[#allocation7_spill]] %s2065_s0 }
   0x2   :  { %2089 = sst [smem:[#allocation8_spill]] %s2066_s1 }
   0x3   :  { %2090 = sst [smem:[#allocation9_spill]] %s2067_s2 }
   0x4   :  { %2091 = sst [smem:[#allocation10_spill]] %s2068_s3 }
   0x5   :  { %18 = vsyncpa [#allocation5], 0 }
   0x6   :  { %20 = vsyncpa [#allocation5 + $0x1], 0  ;;  %s1787_s25 = smov 0   ;;  %s1789_s26 = smov 0  }
   0x7   :  { %s1791_s27 = smov 0   ;;  %s1793_s28 = smov 0  }
   0x8 LB: > { %s1808_s29 = sadd.s32 4294967295, %s1707_s28   ;;  %s1527_s30 = sadd.s32 4294967294, %s1707_s28   ;;  %s1707_s28 = sphi %s1793_s28, %s2106_s28   ;;  %s1703_s27 = sphi %s1791_s27, %s2105_s27   ;;  %s1699_s26 = sphi %s1789_s26, %s2104_s26   ;;  %s1695_s25 = sphi %s1787_s25, %s2103_s25  }
   0x9   : > { %s1812_s14 = sadd.s32 1, %s1707_s28   ;;  %s33_s15 = sadd.s32 1, %s1703_s27 }
   0xa   : > { %s30_s16 = ssub.s32 %s1707_s28, %s1812_s14  ;;  %p40_p0 = scmp.ne.s32.totalorder %s1703_s27, %s1699_s26 }
   0xb   : > { %p31_p1 = scmp.eq.s32.totalorder %s30_s16, 0  ;;  %p41_p2 = scmp.eq.s32.totalorder %s1707_s28, 0 }
   0xc   : > { %p382_p3 = scmp.eq.s32.totalorder %s1808_s29, 1  ;;  %p387_p4 = scmp.ne.s32.totalorder %s1699_s26, %s1695_s25 }
   0xd   : > { %s1824_s17 = scalar_select %p31_p1, %s1703_s27, %s33_s15  }
   0xe   : > { %p42_p5 = por %p41_p2, %p40_p0  ;;  %p1826_p6 = por %p382_p3, %p40_p0 }
   0xf   : > { %p388_p7 = scmp.eq.s32.totalorder %s1527_s30, 1  ;;  %p1529_p9 = scmp.ge.s32.totalorder %s1707_s28, 2 }
  0x11   : > { %p1830_p8 = por %p388_p7, %p387_p4  ;;  %404 = sbr.rel (%p1529_p9) target bundleno = 34 (0x22), region = 16 }
  0x16   : > { %407 = sbr.rel (!%p42_p5) target bundleno = 34 (0x22), region = 20  ;;  %s409_s20 = sand.u32 (%p42_p5), 1, %s1703_s27  }
  0x17   : > { %s1531_s21 = sshll.u32 (%p42_p5), %s1707_s28, 2  ;;  %s1530_s22 = sshll.u32 (%p42_p5), %s409_s20, 3 }
  0x18   : > { %s2094_s0 = sld [smem:[#allocation7_spill]] (%p42_p5)  ;;  %s411_s30 = scalar_lea.vmem (%p42_p5), [#allocation3], %s1530_s22 }
  0x1e   : > { %s413_s15 = scalar_lea.vmem %s2094_s0, %s1531_s21 }
  0x1f   : > { %v430_v0 = vld [vmem:[%s413_s15] sm:$0xf]  ;;  %v432_v1 = vld [vmem:[%s413_s15 + $0x8] sm:$0xf] }
  0x20   : > { %431 = vst [vmem:[%s411_s30] sm:$0xf] %v430_v0 }
  0x21   : > { %433 = vst [vmem:[%s411_s30 + $0x4] sm:$0xf] %v432_v1 }
  0x22 PF: > { %p1532_p10 = scmp.ge.s32.totalorder %s1707_s28, 1  ;;  %p544_p11 = scmp.lt.s32.totalorder %s1707_s28, 3 }
  0x24   : > { %p545_p12 = pnand %p1532_p10, %p544_p11 }
  0x25   : > { %s2079_s16 = sand.u32 (!%p545_p12), 1, %s1699_s26   ;;  %p642_p13 = scmp.lt.s32.totalorder (!%p545_p12), %s1808_s29, 1 }
  0x26   : > { %548 = sbr.rel (%p545_p12) target bundleno = 3116 (0xc2c), region = 109  ;;  %s1847_s20 = sshll.u32 (!%p545_p12), %s2079_s16, 3 }
  0x27   : > { %s553_s21 = scalar_lea.vmem (!%p545_p12), [#allocation3], %s1847_s20  ;;  %s2095_s1 = sld [smem:[#allocation8_spill]] (!%p545_p12) }
  0x28   : > { %s2096_s2 = sld [smem:[#allocation9_spill]] (!%p545_p12)  ;;  %s2084_s24 = smov (!%p545_p12), 1  }
  0x29   : > { %s2086_s15 = smov (!%p545_p12), 127   ;;  %s2080_s16 = smov (!%p545_p12), 3  }
  0x2a   : > { %s2097_s3 = sld [smem:[#allocation10_spill]] (!%p545_p12) }
  0x2b   : > { %vm695_vm0 = vcmask 125952   ;;  %v1850_v2 = vld [vmem:[%s553_s21] sm:$0xf]  ;;  %v1854_v4 = vld [vmem:[%s553_s21 + $0x4] sm:$0xf]  ;;  %vm702_vm1 = vcmask 1043456  }
  0x2c   : > { %v696_v3 = vsel %vm695_vm0, %v1850_v2, 0.0  ;;  %v699_v5 = vsel %vm695_vm0, %v1854_v4, 0.0  ;;  %v1709_v18 = vmov 0   ;;  %s643_s22 = scalar_select %p642_p13, %s1808_s29, 1  ;;  %vm761_vm7 = vcmask 134152  }
  0x2d   : > { %697 = vadd.xlane.f32.xlu0 %v696_v3  ;;  %1614 = vset.pattern.permute.xlu2 %v1709_v18  ;;  %vm770_vm8 = vcmask 3072   ;;  %vm779_vm9 = vcmask 142472   ;;  %vm800_vm10 = vcmask 97280  }
  0x2e   : > { %1620 = vset.pattern.permute.xlu1 %v1709_v18  ;;  %1621 = vset.pattern.permute.xlu0 %v1709_v18  ;;  %s1868_s23 = sshll.u32 %s643_s22, 2 }
  0x2f   : > { %s645_s30 = scalar_lea.vmem %s2095_s1, %s1868_s23  ;;  %s649_s22 = scalar_lea.vmem %s2096_s2, %s1868_s23 }
  0x30   : > { %v692_v31 = vld [vmem:[%s645_s30] sm:$0xf]  ;;  %s2082_s30 = smov 126   ;;  %s657_s21 = scalar_lea.vmem %s2069_s4, %s1868_s23 }
  0x31   : > { %v693_v35 = vld [vmem:[%s649_s22] sm:$0xf]  ;;  %s661_s22 = scalar_lea.vmem %s2070_s5, %s1868_s23  ;;  %s677_s0 = scalar_lea.vmem %s2074_s9, %s1868_s23 }
  0x35   : > { %700 = vadd.xlane.f32.xlu0 %v699_v5 }
  0xa0   : > { %v698_v6 = vpop.xlane.xlu0 %697 }
  0xa1   : > { %v703_v8 = vsel %vm702_vm1, %v698_v6, 0.0 }
  0xa8   : > { %v701_v7 = vpop.xlane.xlu0 %700 }
  0xa9   : > { %v704_v9 = vsel %vm702_vm1, %v701_v7, 0.0 }
  0xaa   : > { %v705_v10 = vadd.f32 %v704_v9, %v703_v8 }
  0xac   : > { %v706_v11 = vmul.f32 0.03125, %v705_v10 }
  0xae   : > { %v707_v12 = vsub.f32 %v1850_v2, %v706_v11  ;;  %v708_v14 = vsub.f32 %v1854_v4, %v706_v11 }
  0xb0   : > { %v709_v13 = vmul.f32 %v707_v12, %v707_v12  ;;  %v710_v16 = vmul.f32 %v708_v14, %v708_v14 }
  0xb2   : > { %v711_v15 = vsel %vm695_vm0, %v709_v13, 0.0  ;;  %v714_v17 = vsel %vm695_vm0, %v710_v16, 0.0 }
  0xb3   : > { %712 = vadd.xlane.f32.xlu1 %v711_v15 }
  0xbb   : > { %715 = vadd.xlane.f32.xlu1 %v714_v17 }
 0x126   : > { %v713_v19 = vpop.xlane.xlu1 %712 }
 0x127   : > { %v717_v21 = vsel %vm702_vm1, %v713_v19, 0.0  ;;  %v849_v19 = vld [vmem:[%s661_s22] sm:$0xf]  ;;  %s2099_s22 = smov 126  }
 0x12e   : > { %v716_v20 = vpop.xlane.xlu1 %715 }
 0x12f   : > { %v718_v22 = vsel %vm702_vm1, %v716_v20, 0.0 }
 0x130   : > { %v719_v23 = vadd.f32 %v718_v22, %v717_v21 }
 0x132   : > { %v720_v24 = vmul.f32 0.03125, %v719_v23 }
 0x134   : > { %v721_v25 = vadd.f32 1e-05, %v720_v24 }
 0x136   : > { %1637 = vrsqrt.f32 %v721_v25  ;;  %vm728_vm3 = vweird.f32 %v721_v25 }
 0x13c   : > { %v1638_v26 = vpop.eup %1637 }
 0x13d   : > { %v723_v27 = vmul.f32 %v1638_v26, %v721_v25  ;;  %vm729_vm2 = vweird.f32 %v1638_v26 }
 0x13e   : > { %vm730_vm4 = vmor %vm728_vm3, %vm729_vm2 }
 0x13f   : > { %v724_v28 = vmul.f32 %v1638_v26, %v723_v27 }
 0x141   : > { %v725_v29 = vmul.f32 0.5, %v724_v28 }
 0x143   : > { %v726_v30 = vsub.f32 1.5, %v725_v29 }
 0x145   : > { %v727_v32 = vmul.f32 %v1638_v26, %v726_v30 }
 0x147   : > { %v731_v33 = vsel %vm730_vm4, %v1638_v26, %v727_v32  ;;  %v848_v32 = vld [vmem:[%s657_s21] sm:$0xf]  ;;  %s673_s21 = scalar_lea.vmem %s2073_s8, %s1868_s23 }
 0x148   : > { %v732_v34 = vmul.f32 %v731_v33, %v692_v31 }
 0x14a   : > { %735 = vperm.xlu2 %1614, %v732_v34  }
 0x152   : > { %742 = vperm.xlu2 %1614, %v693_v35  }
 0x1a4   : > { %v736_v36 = vpop.permute.xlu2 %735 }
 0x1a5   : > { %v738_v37 = vmul.f32 %v736_v36, %v707_v12  ;;  %v739_v38 = vmul.f32 %v736_v36, %v708_v14 }
 0x1ac   : > { %v743_v39 = vpop.permute.xlu2 %742 }
 0x1ad   : > { %v745_v40 = vadd.f32 %v743_v39, %v738_v37  ;;  %v746_v41 = vadd.f32 %v743_v39, %v739_v38 }
 0x1af   : > { %vm748_vm5 = vcmp.ge.f32.partialorder %v746_v41, 0.0  ;;  %v750_v42 = vmul.f32 0.01, %v746_v41  ;;  %vm747_vm6 = vcmp.ge.f32.partialorder %v745_v40, 0.0  ;;  %v749_v43 = vmul.f32 0.01, %v745_v40 }
 0x1b1   : > { %v752_v44 = vsel %vm748_vm5, %v746_v41, %v750_v42  ;;  %v751_v45 = vsel %vm747_vm6, %v745_v40, %v749_v43 }
 0x1b2   : > { %757 = vrot.lane.b32.xlu1 %v752_v44, %s2084_s24  ;;  %764 = vrot.lane.b32.xlu2 %v751_v45, %s2086_s15 }
 0x1b3   : > { %755 = vrot.lane.b32.xlu0 %v751_v45, %s2084_s24 }
 0x1ba   : > { %766 = vrot.lane.b32.xlu2 %v752_v44, %s2086_s15 }
 0x1bb   : > { %775 = vrot.lane.b32.xlu0 %v752_v44, %s2080_s16 }
 0x1c2   : > { %773 = vrot.lane.b32.xlu2 %v751_v45, %s2080_s16  ;;  %s653_s16 = scalar_lea.vmem %s2097_s3, %s1868_s23 }
 0x1c3   : > { %v694_v62 = vld [vmem:[%s653_s16] sm:$0xf]  ;;  %s669_s16 = scalar_lea.vmem %s2072_s7, %s1868_s23 }
 0x20c   : > { %v765_v46 = vpop.permute.xlu2 %764 }
 0x214   : > { %v767_v47 = vpop.permute.xlu2 %766 }
 0x21c   : > { %v774_v50 = vpop.permute.xlu2 %773 }
 0x224   : > { %v758_v48 = vpop.permute.xlu1 %757 }
 0x225   : > { %763 = vst.msk [vmem:[#allocation2 + $0x4] sm:$0xf] %vm761_vm7, %v758_v48  ;;  %v756_v49 = vpop.permute.xlu0 %755 }
 0x226   : > { %772 = vst.msk [vmem:[#allocation2 + $0x4] sm:$0xf] %vm770_vm8, %v767_v47 }
 0x227   : > { %762 = vst.msk [vmem:[#allocation2] sm:$0xf] %vm761_vm7, %v756_v49 }
 0x228   : > { %771 = vst.msk [vmem:[#allocation2] sm:$0xf] %vm770_vm8, %v765_v46 }
 0x229   : > { %780 = vst.msk [vmem:[#allocation2] sm:$0xf] %vm779_vm9, %v774_v50 }
 0x22d   : > { %v776_v51 = vpop.permute.xlu0 %775 }
 0x22e   : > { %781 = vst.msk [vmem:[#allocation2 + $0x4] sm:$0xf] %vm779_vm9, %v776_v51 }
 0x230   : > { %v782_v52 = vld [vmem:[#allocation2] sm:$0xf] }
 0x231   : > { %794 = vrot.lane.b32.xlu2 %v782_v52, %s2082_s30  ;;  %v786_v54 = vrot.slane %v782_v52, 4 }
 0x235   : > { %v783_v53 = vld [vmem:[#allocation2 + $0x4] sm:$0xf] }
 0x236   : > { %796 = vrot.lane.b32.xlu1 %v783_v53, %s2082_s30  ;;  %v787_v55 = vrot.slane %v783_v53, 4  ;;  %s2098_s30 = smov 3  }
 0x238   : > { %v1615_v56 = vpack.i.bf16 %v787_v55, %v786_v54 }
 0x23a   : > { %1616 = vrot.lane.b32.xlu0 %v1615_v56, %s2086_s15 }
 0x28b   : > { %v795_v57 = vpop.permute.xlu2 %794 }
 0x28c   : > { %1547 = vmatpush.msk.msra.mxu0 %vm702_vm1, %v795_v57 }
 0x2a8   : > { %v797_v58 = vpop.permute.xlu1 %796 }
 0x2a9   : > { %1549 = vmatpush.msk.msra.mxu1 %vm702_vm1, %v797_v58 }
 0x2ac   : > { %v1617_v59 = vpop.permute.xlu0 %1616 }
 0x2ad   : > { %v1619_v60 = vunpack.i.h.bf16 %v1617_v59  ;;  %v1618_v61 = vunpack.i.l.bf16 %v1617_v59 }
 0x2af   : > { %v798_v63 = vsel %vm702_vm1, %v782_v52, %v1618_v61  ;;  %v799_v0 = vsel %vm702_vm1, %v783_v53, %v1619_v60 }
 0x2b0   : > { %821 = vmatpush.msra.mxu0 %v798_v63  ;;  %843 = vmatpush.msra.mxu1 %v799_v0 }
 0x2b1   : > { %1548 = vmatmul.msk.f32.vlgmr.msra.gmra.mxu0 %vm800_vm10, %v694_v62  ;;  %1550 = vmatmul.msk.f32.vlgmr.msra.gmra.mxu1 %vm800_vm10, %v694_v62 }
 0x32e   : > { %v823_v1 = vpop.f32.mrf.mxu0  ;;  %v845_v3 = vpop.f32.mrf.mxu1 }
 0x32f   : > { %v854_v5 = vsel %vm695_vm0, %v845_v3, 0.0  ;;  %v851_v6 = vsel %vm695_vm0, %v823_v1, 0.0 }
 0x330   : > { %855 = vadd.xlane.f32.xlu1 %v854_v5  ;;  %852 = vadd.xlane.f32.xlu2 %v851_v6 }
 0x3a3   : > { %v856_v7 = vpop.xlane.xlu1 %855  ;;  %v853_v8 = vpop.xlane.xlu2 %852 }
 0x3a4   : > { %v858_v9 = vsel %vm702_vm1, %v856_v7, 0.0  ;;  %v857_v10 = vsel %vm702_vm1, %v853_v8, 0.0 }
 0x3a5   : > { %v859_v11 = vadd.f32 %v858_v9, %v857_v10 }
 0x3a7   : > { %v860_v12 = vmul.f32 0.03125, %v859_v11 }
 0x3a9   : > { %v861_v13 = vsub.f32 %v823_v1, %v860_v12  ;;  %v862_v14 = vsub.f32 %v845_v3, %v860_v12 }
 0x3ab   : > { %v864_v15 = vmul.f32 %v862_v14, %v862_v14  ;;  %v863_v16 = vmul.f32 %v861_v13, %v861_v13 }
 0x3ad   : > { %v868_v17 = vsel %vm695_vm0, %v864_v15, 0.0  ;;  %v865_v18 = vsel %vm695_vm0, %v863_v16, 0.0 }
 0x3ae   : > { %869 = vadd.xlane.f32.xlu2 %v868_v17  ;;  %866 = vadd.xlane.f32.xlu0 %v865_v18 }
 0x3c2   : > { %896 = vperm.xlu0 %1621, %v849_v19   ;;  %v999_v19 = vld [vmem:[%s673_s21] sm:$0xf]  ;;  %s2101_s21 = smov 1  }
 0x421   : > { %v870_v20 = vpop.xlane.xlu2 %869  ;;  %v867_v21 = vpop.xlane.xlu0 %866 }
 0x422   : > { %v872_v22 = vsel %vm702_vm1, %v870_v20, 0.0  ;;  %v871_v23 = vsel %vm702_vm1, %v867_v21, 0.0 }
 0x423   : > { %v873_v24 = vadd.f32 %v872_v22, %v871_v23 }
 0x425   : > { %v874_v25 = vmul.f32 0.03125, %v873_v24 }
 0x427   : > { %v875_v26 = vadd.f32 1e-05, %v874_v25 }
 0x429   : > { %1639 = vrsqrt.f32 %v875_v26  ;;  %vm882_vm12 = vweird.f32 %v875_v26 }
 0x42f   : > { %v1640_v27 = vpop.eup %1639 }
 0x430   : > { %v877_v28 = vmul.f32 %v1640_v27, %v875_v26  ;;  %vm883_vm11 = vweird.f32 %v1640_v27 }
 0x431   : > { %vm884_vm13 = vmor %vm882_vm12, %vm883_vm11 }
 0x432   : > { %v878_v29 = vmul.f32 %v1640_v27, %v877_v28 }
 0x434   : > { %v879_v30 = vmul.f32 0.5, %v878_v29  ;;  %v897_v37 = vpop.permute.xlu0 %896 }
 0x436   : > { %v880_v31 = vsub.f32 1.5, %v879_v30 }
 0x438   : > { %v881_v33 = vmul.f32 %v1640_v27, %v880_v31 }
 0x43a   : > { %v885_v34 = vsel %vm884_vm13, %v1640_v27, %v881_v33 }
 0x43b   : > { %v886_v35 = vmul.f32 %v885_v34, %v848_v32  ;;  %v998_v32 = vld [vmem:[%s669_s16] sm:$0xf]  ;;  %s685_s16 = scalar_lea.vmem %s2076_s11, %s1868_s23 }
 0x43d   : > { %889 = vperm.xlu1 %1620, %v886_v35  }
 0x4af   : > { %v890_v36 = vpop.permute.xlu1 %889 }
 0x4b0   : > { %v892_v38 = vmul.f32 %v890_v36, %v861_v13  ;;  %v893_v39 = vmul.f32 %v890_v36, %v862_v14 }
 0x4b2   : > { %v899_v40 = vadd.f32 %v897_v37, %v892_v38  ;;  %v900_v41 = vadd.f32 %v897_v37, %v893_v39 }
 0x4b4   : > { %vm902_vm14 = vcmp.ge.f32.partialorder %v900_v41, 0.0  ;;  %v904_v42 = vmul.f32 0.01, %v900_v41  ;;  %vm901_vm15 = vcmp.ge.f32.partialorder %v899_v40, 0.0  ;;  %v903_v43 = vmul.f32 0.01, %v899_v40 }
 0x4b6   : > { %v906_v44 = vsel %vm902_vm14, %v900_v41, %v904_v42  ;;  %v905_v45 = vsel %vm901_vm15, %v899_v40, %v903_v43 }
 0x4b7   : > { %911 = vrot.lane.b32.xlu1 %v906_v44, %s2084_s24  ;;  %909 = vrot.lane.b32.xlu2 %v905_v45, %s2084_s24  ;;  %s665_s24 = scalar_lea.vmem %s2071_s6, %s1868_s23 }
 0x4b8   : > { %v850_v62 = vld [vmem:[%s665_s24] sm:$0xf]  ;;  %s681_s24 = scalar_lea.vmem %s2075_s10, %s1868_s23 }
 0x4bf   : > { %919 = vrot.lane.b32.xlu1 %v906_v44, %s2086_s15  ;;  %917 = vrot.lane.b32.xlu2 %v905_v45, %s2086_s15 }
 0x4c7   : > { %927 = vrot.lane.b32.xlu1 %v906_v44, %s2098_s30  ;;  %925 = vrot.lane.b32.xlu2 %v905_v45, %s2098_s30 }
 0x511   : > { %v910_v46 = vpop.permute.xlu2 %909 }
 0x512   : > { %915 = vst.msk [vmem:[#allocation2] sm:$0xf] %vm761_vm7, %v910_v46 }
 0x519   : > { %v918_v47 = vpop.permute.xlu2 %917 }
 0x51a   : > { %923 = vst.msk [vmem:[#allocation2] sm:$0xf] %vm770_vm8, %v918_v47 }
 0x521   : > { %v926_v48 = vpop.permute.xlu2 %925 }
 0x522   : > { %931 = vst.msk [vmem:[#allocation2] sm:$0xf] %vm779_vm9, %v926_v48 }
 0x529   : > { %v912_v49 = vpop.permute.xlu1 %911  ;;  %v933_v50 = vld [vmem:[#allocation2] sm:$0xf] }
 0x52a   : > { %916 = vst.msk [vmem:[#allocation2 + $0x4] sm:$0xf] %vm761_vm7, %v912_v49  ;;  %945 = vrot.lane.b32.xlu0 %v933_v50, %s2099_s22  ;;  %v937_v54 = vrot.slane %v933_v50, 4 }
 0x531   : > { %v920_v51 = vpop.permute.xlu1 %919 }
 0x532   : > { %924 = vst.msk [vmem:[#allocation2 + $0x4] sm:$0xf] %vm770_vm8, %v920_v51 }
 0x539   : > { %v928_v52 = vpop.permute.xlu1 %927 }
 0x53a   : > { %932 = vst.msk [vmem:[#allocation2 + $0x4] sm:$0xf] %vm779_vm9, %v928_v52 }
 0x541   : > { %v934_v53 = vld [vmem:[#allocation2 + $0x4] sm:$0xf] }
 0x542   : > { %947 = vrot.lane.b32.xlu2 %v934_v53, %s2099_s22  ;;  %v938_v55 = vrot.slane %v934_v53, 4 }
 0x544   : > { %v1622_v56 = vpack.i.bf16 %v938_v55, %v937_v54 }
 0x546   : > { %1623 = vrot.lane.b32.xlu1 %v1622_v56, %s2086_s15  ;;  %s2100_s15 = smov 127  }
 0x59c   : > { %v946_v57 = vpop.permute.xlu0 %945  ;;  %v948_v58 = vpop.permute.xlu2 %947 }
 0x59d   : > { %1551 = vmatpush.msk.msra.mxu2 %vm702_vm1, %v946_v57  ;;  %1553 = vmatpush.msk.msra.mxu3 %vm702_vm1, %v948_v58 }
 0x5b8   : > { %v1624_v59 = vpop.permute.xlu1 %1623 }
 0x5b9   : > { %v1626_v60 = vunpack.i.h.bf16 %v1624_v59  ;;  %v1625_v61 = vunpack.i.l.bf16 %v1624_v59 }
 0x5bb   : > { %v949_v63 = vsel %vm702_vm1, %v933_v50, %v1625_v61  ;;  %v950_v0 = vsel %vm702_vm1, %v934_v53, %v1626_v60 }
 0x5bc   : > { %971 = vmatpush.msra.mxu2 %v949_v63  ;;  %993 = vmatpush.msra.mxu3 %v950_v0 }
 0x5bd   : > { %1552 = vmatmul.msk.f32.vlgmr.msra.gmra.mxu2 %vm800_vm10, %v850_v62  ;;  %1554 = vmatmul.msk.f32.vlgmr.msra.gmra.mxu3 %vm800_vm10, %v850_v62  ;;  %v1000_v62 = vld [vmem:[%s677_s0] sm:$0xf]  ;;  %s641_s0 = scalar_lea.vmem [#allocation4], %s1847_s20 }
 0x640   : > { %v973_v1 = vpop.f32.mrf.mxu2  ;;  %v995_v3 = vpop.f32.mrf.mxu3 }
 0x641   : > { %v1001_v5 = vsel %vm695_vm0, %v973_v1, 0.0  ;;  %v1004_v6 = vsel %vm695_vm0, %v995_v3, 0.0 }
 0x642   : > { %1002 = vadd.xlane.f32.xlu0 %v1001_v5  ;;  %1005 = vadd.xlane.f32.xlu2 %v1004_v6 }
 0x6b5   : > { %v1003_v7 = vpop.xlane.xlu0 %1002  ;;  %v1006_v8 = vpop.xlane.xlu2 %1005 }
 0x6b6   : > { %v1007_v9 = vsel %vm702_vm1, %v1003_v7, 0.0  ;;  %v1008_v10 = vsel %vm702_vm1, %v1006_v8, 0.0 }
 0x6b7   : > { %v1009_v11 = vadd.f32 %v1008_v10, %v1007_v9 }
 0x6b9   : > { %v1010_v12 = vmul.f32 0.03125, %v1009_v11 }
 0x6bb   : > { %v1011_v13 = vsub.f32 %v973_v1, %v1010_v12  ;;  %v1012_v14 = vsub.f32 %v995_v3, %v1010_v12 }
 0x6bd   : > { %v1014_v15 = vmul.f32 %v1012_v14, %v1012_v14  ;;  %v1013_v16 = vmul.f32 %v1011_v13, %v1011_v13 }
 0x6bf   : > { %v1018_v17 = vsel %vm695_vm0, %v1014_v15, 0.0  ;;  %v1015_v18 = vsel %vm695_vm0, %v1013_v16, 0.0 }
 0x6c0   : > { %1019 = vadd.xlane.f32.xlu0 %v1018_v17  ;;  %1016 = vadd.xlane.f32.xlu1 %v1015_v18 }
 0x6d9   : > { %1046 = vperm.xlu1 %1620, %v999_v19   ;;  %v1149_v19 = vld [vmem:[%s685_s16] sm:$0xf] }
 0x733   : > { %v1020_v20 = vpop.xlane.xlu0 %1019  ;;  %v1017_v21 = vpop.xlane.xlu1 %1016 }
 0x734   : > { %v1022_v22 = vsel %vm702_vm1, %v1020_v20, 0.0  ;;  %v1021_v23 = vsel %vm702_vm1, %v1017_v21, 0.0 }
 0x735   : > { %v1023_v24 = vadd.f32 %v1022_v22, %v1021_v23 }
 0x737   : > { %v1024_v25 = vmul.f32 0.03125, %v1023_v24 }
 0x739   : > { %v1025_v26 = vadd.f32 1e-05, %v1024_v25 }
 0x73b   : > { %1641 = vrsqrt.f32 %v1025_v26  ;;  %vm1032_vm3 = vweird.f32 %v1025_v26 }
 0x741   : > { %v1642_v27 = vpop.eup %1641 }
 0x742   : > { %v1027_v28 = vmul.f32 %v1642_v27, %v1025_v26  ;;  %vm1033_vm2 = vweird.f32 %v1642_v27 }
 0x743   : > { %vm1034_vm4 = vmor %vm1032_vm3, %vm1033_vm2 }
 0x744   : > { %v1028_v29 = vmul.f32 %v1642_v27, %v1027_v28 }
 0x746   : > { %v1029_v30 = vmul.f32 0.5, %v1028_v29 }
 0x748   : > { %v1030_v31 = vsub.f32 1.5, %v1029_v30 }
 0x74a   : > { %v1031_v33 = vmul.f32 %v1642_v27, %v1030_v31 }
 0x74b   : > { %v1047_v39 = vpop.permute.xlu1 %1046 }
 0x74c   : > { %v1035_v34 = vsel %vm1034_vm4, %v1642_v27, %v1031_v33 }
 0x74d   : > { %v1036_v35 = vmul.f32 %v1035_v34, %v998_v32  ;;  %v1148_v32 = vld [vmem:[%s681_s24] sm:$0xf]  ;;  %s1312_s24 = sshll.u32 %s641_s0, 4  ;;  %s1313_s24 = int_to_ptr.vmem [resolvable:$true] %s1312_s24 }
 0x74f   : > { %1039 = vperm.xlu2 %1614, %v1036_v35  }
 0x7a9   : > { %v1040_v36 = vpop.permute.xlu2 %1039 }
 0x7aa   : > { %v1042_v37 = vmul.f32 %v1040_v36, %v1011_v13  ;;  %v1043_v38 = vmul.f32 %v1040_v36, %v1012_v14 }
 0x7ac   : > { %v1049_v40 = vadd.f32 %v1047_v39, %v1042_v37  ;;  %v1050_v41 = vadd.f32 %v1047_v39, %v1043_v38 }
 0x7ae   : > { %vm1052_vm5 = vcmp.ge.f32.partialorder %v1050_v41, 0.0  ;;  %v1054_v42 = vmul.f32 0.01, %v1050_v41  ;;  %vm1051_vm6 = vcmp.ge.f32.partialorder %v1049_v40, 0.0  ;;  %v1053_v43 = vmul.f32 0.01, %v1049_v40 }
 0x7b0   : > { %v1056_v44 = vsel %vm1052_vm5, %v1050_v41, %v1054_v42  ;;  %v1055_v45 = vsel %vm1051_vm6, %v1049_v40, %v1053_v43 }
 0x7b1   : > { %1069 = vrot.lane.b32.xlu1 %v1056_v44, %s2100_s15  ;;  %1061 = vrot.lane.b32.xlu2 %v1056_v44, %s2101_s21 }
 0x7b2   : > { %1059 = vrot.lane.b32.xlu0 %v1055_v45, %s2101_s21 }
 0x7b9   : > { %1075 = vrot.lane.b32.xlu2 %v1055_v45, %s2098_s30 }
 0x7ba   : > { %1067 = vrot.lane.b32.xlu0 %v1055_v45, %s2100_s15 }
 0x7c2   : > { %1077 = vrot.lane.b32.xlu0 %v1056_v44, %s2098_s30 }
 0x80b   : > { %v1062_v46 = vpop.permute.xlu2 %1061 }
 0x80c   : > { %1066 = vst.msk [vmem:[#allocation2 + $0x4] sm:$0xf] %vm761_vm7, %v1062_v46 }
 0x813   : > { %v1076_v50 = vpop.permute.xlu2 %1075 }
 0x823   : > { %v1070_v47 = vpop.permute.xlu1 %1069 }
 0x824   : > { %1074 = vst.msk [vmem:[#allocation2 + $0x4] sm:$0xf] %vm770_vm8, %v1070_v47  ;;  %v1060_v48 = vpop.permute.xlu0 %1059 }
 0x825   : > { %1065 = vst.msk [vmem:[#allocation2] sm:$0xf] %vm761_vm7, %v1060_v48 }
 0x82c   : > { %v1068_v49 = vpop.permute.xlu0 %1067 }
 0x82d   : > { %1073 = vst.msk [vmem:[#allocation2] sm:$0xf] %vm770_vm8, %v1068_v49 }
 0x82e   : > { %1081 = vst.msk [vmem:[#allocation2] sm:$0xf] %vm779_vm9, %v1076_v50 }
 0x834   : > { %v1078_v51 = vpop.permute.xlu0 %1077 }
 0x835   : > { %1082 = vst.msk [vmem:[#allocation2 + $0x4] sm:$0xf] %vm779_vm9, %v1078_v51  ;;  %v1083_v52 = vld [vmem:[#allocation2] sm:$0xf] }
 0x836   : > { %1095 = vrot.lane.b32.xlu1 %v1083_v52, %s2099_s22  ;;  %v1087_v54 = vrot.slane %v1083_v52, 4 }
 0x83c   : > { %v1084_v53 = vld [vmem:[#allocation2 + $0x4] sm:$0xf] }
 0x83d   : > { %1097 = vrot.lane.b32.xlu2 %v1084_v53, %s2099_s22  ;;  %v1088_v55 = vrot.slane %v1084_v53, 4 }
 0x83f   : > { %v1627_v56 = vpack.i.bf16 %v1088_v55, %v1087_v54 }
 0x841   : > { %1628 = vrot.lane.b32.xlu0 %v1627_v56, %s2100_s15 }
 0x897   : > { %v1098_v57 = vpop.permute.xlu2 %1097 }
 0x898   : > { %1557 = vmatpush.msk.msrb.mxu1 %vm702_vm1, %v1098_v57 }
 0x8a8   : > { %v1096_v58 = vpop.permute.xlu1 %1095 }
 0x8a9   : > { %1555 = vmatpush.msk.msrb.mxu0 %vm702_vm1, %v1096_v58 }
 0x8b3   : > { %v1629_v59 = vpop.permute.xlu0 %1628 }
 0x8b4   : > { %v1631_v60 = vunpack.i.h.bf16 %v1629_v59  ;;  %v1630_v61 = vunpack.i.l.bf16 %v1629_v59 }
 0x8b6   : > { %v1099_v63 = vsel %vm702_vm1, %v1083_v52, %v1630_v61  ;;  %v1100_v0 = vsel %vm702_vm1, %v1084_v53, %v1631_v60 }
 0x8b7   : > { %1121 = vmatpush.msrb.mxu0 %v1099_v63  ;;  %1143 = vmatpush.msrb.mxu1 %v1100_v0 }
 0x8b8   : > { %1556 = vmatmul.msk.f32.vlgmr.msrb.gmra.mxu0 %vm800_vm10, %v1000_v62  ;;  %1558 = vmatmul.msk.f32.vlgmr.msrb.gmra.mxu1 %vm800_vm10, %v1000_v62 }
 0x935   : > { %v1123_v1 = vpop.f32.mrf.mxu0  ;;  %v1145_v3 = vpop.f32.mrf.mxu1 }
 0x936   : > { %v1154_v5 = vsel %vm695_vm0, %v1145_v3, 0.0  ;;  %v1151_v6 = vsel %vm695_vm0, %v1123_v1, 0.0 }
 0x937   : > { %1155 = vadd.xlane.f32.xlu2 %v1154_v5  ;;  %1152 = vadd.xlane.f32.xlu1 %v1151_v6 }
 0x9aa   : > { %v1156_v7 = vpop.xlane.xlu2 %1155  ;;  %v1153_v8 = vpop.xlane.xlu1 %1152 }
 0x9ab   : > { %v1158_v9 = vsel %vm702_vm1, %v1156_v7, 0.0  ;;  %v1157_v10 = vsel %vm702_vm1, %v1153_v8, 0.0 }
 0x9ac   : > { %v1159_v11 = vadd.f32 %v1158_v9, %v1157_v10 }
 0x9ae   : > { %v1160_v12 = vmul.f32 0.03125, %v1159_v11 }
 0x9b0   : > { %v1161_v13 = vsub.f32 %v1123_v1, %v1160_v12  ;;  %v1162_v14 = vsub.f32 %v1145_v3, %v1160_v12 }
 0x9b2   : > { %v1164_v15 = vmul.f32 %v1162_v14, %v1162_v14  ;;  %v1163_v16 = vmul.f32 %v1161_v13, %v1161_v13 }
 0x9b4   : > { %v1168_v17 = vsel %vm695_vm0, %v1164_v15, 0.0  ;;  %v1165_v18 = vsel %vm695_vm0, %v1163_v16, 0.0 }
 0x9b5   : > { %1169 = vadd.xlane.f32.xlu1 %v1168_v17  ;;  %1166 = vadd.xlane.f32.xlu0 %v1165_v18 }
 0x9c9   : > { %1196 = vperm.xlu0 %1621, %v1149_v19  }
 0xa28   : > { %v1170_v20 = vpop.xlane.xlu1 %1169  ;;  %v1167_v21 = vpop.xlane.xlu0 %1166 }
 0xa29   : > { %v1172_v22 = vsel %vm702_vm1, %v1170_v20, 0.0  ;;  %v1171_v23 = vsel %vm702_vm1, %v1167_v21, 0.0 }
 0xa2a   : > { %v1173_v24 = vadd.f32 %v1172_v22, %v1171_v23 }
 0xa2c   : > { %v1174_v25 = vmul.f32 0.03125, %v1173_v24 }
 0xa2e   : > { %v1175_v26 = vadd.f32 1e-05, %v1174_v25 }
 0xa30   : > { %1643 = vrsqrt.f32 %v1175_v26  ;;  %vm1182_vm12 = vweird.f32 %v1175_v26 }
 0xa36   : > { %v1644_v27 = vpop.eup %1643 }
 0xa37   : > { %v1177_v28 = vmul.f32 %v1644_v27, %v1175_v26  ;;  %vm1183_vm11 = vweird.f32 %v1644_v27 }
 0xa38   : > { %vm1184_vm13 = vmor %vm1182_vm12, %vm1183_vm11 }
 0xa39   : > { %v1178_v29 = vmul.f32 %v1644_v27, %v1177_v28 }
 0xa3b   : > { %v1179_v30 = vmul.f32 0.5, %v1178_v29  ;;  %v1197_v39 = vpop.permute.xlu0 %1196 }
 0xa3d   : > { %v1180_v31 = vsub.f32 1.5, %v1179_v30 }
 0xa3f   : > { %v1181_v33 = vmul.f32 %v1644_v27, %v1180_v31 }
 0xa41   : > { %v1185_v34 = vsel %vm1184_vm13, %v1644_v27, %v1181_v33 }
 0xa42   : > { %v1186_v35 = vmul.f32 %v1185_v34, %v1148_v32 }
 0xa44   : > { %1189 = vperm.xlu2 %1614, %v1186_v35  }
 0xa9e   : > { %v1190_v36 = vpop.permute.xlu2 %1189 }
 0xa9f   : > { %v1192_v37 = vmul.f32 %v1190_v36, %v1161_v13  ;;  %v1193_v38 = vmul.f32 %v1190_v36, %v1162_v14 }
 0xaa1   : > { %v1199_v40 = vadd.f32 %v1197_v39, %v1192_v37  ;;  %v1200_v41 = vadd.f32 %v1197_v39, %v1193_v38 }
 0xaa3   : > { %vm1202_vm14 = vcmp.ge.f32.partialorder %v1200_v41, 0.0  ;;  %v1204_v42 = vmul.f32 0.01, %v1200_v41  ;;  %vm1201_vm15 = vcmp.ge.f32.partialorder %v1199_v40, 0.0  ;;  %v1203_v43 = vmul.f32 0.01, %v1199_v40 }
 0xaa5   : > { %v1206_v44 = vsel %vm1202_vm14, %v1200_v41, %v1204_v42  ;;  %v1205_v45 = vsel %vm1201_vm15, %v1199_v40, %v1203_v43 }
 0xaa6   : > { %1211 = vrot.lane.b32.xlu0 %v1206_v44, %s2101_s21  ;;  %1217 = vrot.lane.b32.xlu2 %v1205_v45, %s2100_s15 }
 0xaa7   : > { %1209 = vrot.lane.b32.xlu1 %v1205_v45, %s2101_s21  ;;  %s689_s21 = scalar_lea.vmem %s2077_s12, %s1868_s23  ;;  %s1564_s23 = sshll.u32 %s1808_s29, 2 }
 0xaa8   : > { %v1150_v62 = vld [vmem:[%s689_s21] sm:$0xf]  ;;  %s1311_s16 = scalar_lea.hbm %s2078_s13, %s1564_s23  ;;  %s2102_s29 = sand.u32 1, %s1699_s26  }
 0xaa9   : > { %s1314_s1 = sshll.u32 %s1311_s16, 4  ;;  %s1315_s1 = int_to_ptr.hbm [resolvable:$true] %s1314_s1 }
 0xaaa   : > { %s1659_s21 = sshra.s32 %s1315_s1, 4  ;;  %s1660_s21 = int_to_ptr.hbm [resolvable:$true] %s1659_s21 }
 0xaab   : > { %s1661_s20 = scalar_lea.hbm %s1660_s21, 8  ;;  %p1666_p3 = scmp.lt.s32.totalorder %s1660_s21, %s2078_s13 }
 0xaac   : > { %p1662_p0 = scmp.ne.s32.totalorder %s1660_s21, %s1661_s20 }
 0xaae   : > { %1219 = vrot.lane.b32.xlu0 %v1206_v44, %s2100_s15  ;;  %1227 = vrot.lane.b32.xlu2 %v1206_v44, %s2098_s30  ;;  %p1663_p1 = pnand %p1662_p0, %p1826_p6 }
 0xaaf   : > { %1225 = vrot.lane.b32.xlu1 %v1205_v45, %s2098_s30  ;;  %s1301_s30 = scalar_lea.sflag [#allocation5], %s2102_s29 }
 0xab0   : > { %p1664_p2 = pneg %p1663_p1 }
 0xb00   : > { %v1218_v46 = vpop.permute.xlu2 %1217 }
 0xb08   : > { %v1228_v50 = vpop.permute.xlu2 %1227 }
 0xb18   : > { %v1212_v47 = vpop.permute.xlu0 %1211 }
 0xb19   : > { %1216 = vst.msk [vmem:[#allocation2 + $0x4] sm:$0xf] %vm761_vm7, %v1212_v47  ;;  %v1210_v48 = vpop.permute.xlu1 %1209 }
 0xb1a   : > { %1215 = vst.msk [vmem:[#allocation2] sm:$0xf] %vm761_vm7, %v1210_v48 }
 0xb1b   : > { %1223 = vst.msk [vmem:[#allocation2] sm:$0xf] %vm770_vm8, %v1218_v46 }
 0xb20   : > { %v1220_v49 = vpop.permute.xlu0 %1219 }
 0xb21   : > { %1224 = vst.msk [vmem:[#allocation2 + $0x4] sm:$0xf] %vm770_vm8, %v1220_v49  ;;  %v1226_v51 = vpop.permute.xlu1 %1225 }
 0xb22   : > { %1232 = vst.msk [vmem:[#allocation2 + $0x4] sm:$0xf] %vm779_vm9, %v1228_v50 }
 0xb23   : > { %1231 = vst.msk [vmem:[#allocation2] sm:$0xf] %vm779_vm9, %v1226_v51 }
 0xb29   : > { %v1234_v52 = vld [vmem:[#allocation2 + $0x4] sm:$0xf] }
 0xb2a   : > { %v1233_v53 = vld [vmem:[#allocation2] sm:$0xf]  ;;  %v1238_v54 = vrot.slane %v1234_v52, 4  ;;  %1247 = vrot.lane.b32.xlu1 %v1234_v52, %s2099_s22 }
 0xb2b   : > { %1245 = vrot.lane.b32.xlu0 %v1233_v53, %s2099_s22  ;;  %v1237_v55 = vrot.slane %v1233_v53, 4 }
 0xb2d   : > { %v1632_v56 = vpack.i.bf16 %v1238_v54, %v1237_v55 }
 0xb2f   : > { %1633 = vrot.lane.b32.xlu2 %v1632_v56, %s2100_s15  ;;  %s1665_s15 = scalar_lea.hbm %s2078_s13, 16 }
 0xb30   : > { %p1667_p4 = scmp.lt.s32.totalorder %s1665_s15, %s1661_s20 }
 0xb32   : > { %p1668_p5 = por %p1667_p4, %p1666_p3 }
 0xb34   : > { %p1669_p7 = pnand %p1668_p5, %p1664_p2 }
 0xb89   : > { %v1634_v57 = vpop.permute.xlu2 %1633 }
 0xb8a   : > { %v1636_v58 = vunpack.i.h.bf16 %v1634_v57  ;;  %v1635_v59 = vunpack.i.l.bf16 %v1634_v57 }
 0xb8c   : > { %v1250_v63 = vsel %vm702_vm1, %v1234_v52, %v1636_v58  ;;  %v1249_v0 = vsel %vm702_vm1, %v1233_v53, %v1635_v59 }
 0xb9c   : > { %v1248_v60 = vpop.permute.xlu1 %1247 }
 0xb9d   : > { %v1246_v61 = vpop.permute.xlu0 %1245  ;;  %1561 = vmatpush.msk.msrb.mxu3 %vm702_vm1, %v1248_v60 }
 0xb9e   : > { %1559 = vmatpush.msk.msrb.mxu2 %vm702_vm1, %v1246_v61 }
 0xb9f   : > { %1293 = vmatpush.msrb.mxu3 %v1250_v63 }
 0xba0   : > { %1271 = vmatpush.msrb.mxu2 %v1249_v0  ;;  %1562 = vmatmul.msk.f32.vlgmr.msrb.gmra.mxu3 %vm800_vm10, %v1150_v62 }
 0xba1   : > { %1560 = vmatmul.msk.f32.vlgmr.msrb.gmra.mxu2 %vm800_vm10, %v1150_v62 }
 0xc23   : > { %v1295_v1 = vpop.f32.mrf.mxu3 }
 0xc24   : > { %v1273_v3 = vpop.f32.mrf.mxu2  ;;  %v1296_v5 = vadd.f32 %v1295_v1, %v1854_v4 }
 0xc25   : > { %v1274_v6 = vadd.f32 %v1273_v3, %v1850_v2 }
 0xc26   : > { %1299 = vst.msk [vmem:[%s641_s0 + $0x4] sm:$0xf] %vm695_vm0, %v1296_v5 }
 0xc27   : > { %1298 = vst.msk [vmem:[%s641_s0] sm:$0xf] %vm695_vm0, %v1274_v6 }
 0xc28   : > { %1672 = shalt.err (!%p1669_p7)
}
 0xc29   : > { %s1714_s0 = smov 64   ;;  %s1715_s29 = smov 128  }
 0xc2a   : > { %s1716_s3 = smov 4  }
 0xc2b   : > { %1567 = dma.vmem_to_hbm [thread:$0]  (%p1826_p6), %s1313_s24, 128, %s1315_s1, %s1301_s30, %s1714_s0, %s1715_s29, %s1716_s3  }
 0xc2c PF: > { %s1329_s23 = sand.u32 1, %s1695_s25   ;;  %p1570_p10 = pnand %p1529_p9, %p1830_p8 }
 0xc2d   : > { %s1330_s2 = scalar_lea.sflag [#allocation5], %s1329_s23 }
 0xc2e   : > { %p1571_p11 = pneg %p1570_p10 }
 0xc30   : > { %1690 = dma.done.wait (%p1571_p11), %s1330_s2, 128  }
 0xc31   : > { %1692 = vsyncadd (%p1571_p11), %s1330_s2, 4294967168  ;;  %p23_p12 = scmp.ge.s32.totalorder %s1812_s14, 4   ;;  %s2103_s25 = smov %s1699_s26 }
 0xc32   : > { %s2104_s26 = smov %s1703_s27  ;;  %s2105_s27 = smov %s1824_s17 }
 0xc33   : > { %s2106_s28 = smov %s1812_s14  ;;  %25 = sbr.rel (!%p23_p12) target bundleno = 8 (0x8), region = 189 }
 0xc38   :  { %1336 = vsyncpa [#allocation5], 1 }
 0xc39   :  { %1338 = vsyncpa [#allocation5 + $0x1], 1 }

</bundles_post_ra>
